<compile_context>
chip_gen: v7x
topology: tpu7x:2x2x1
jax: 0.10.0
libtpu: 0.0.40
codegen_flags: <defaults>
</compile_context>

<pallas_src>
import functools

import jax
import jax.numpy as jnp
from jax.experimental import pallas as pl
from jax.experimental.pallas import tpu as pltpu


# ------------------------------ fused kernel ------------------------------- #

def _mbconv_fused_kernel(x_ref,
                         w_pre_ref, b_pre_ref,
                         w_dw_ref, b_dw_ref,
                         w_pw_ref, b_pw_ref,
                         w_se1_ref, b_se1_ref,
                         w_se2_ref, b_se2_ref,
                         w_post_ref, b_post_ref,
                         o_ref, *, H, W):
    HW, C = x_ref.shape
    f32 = jnp.float32

    # ---- pre 1x1 conv (BN0 folded into weight/bias), bf16 MXU -------------
    x_bf = x_ref[...].astype(jnp.bfloat16)
    z1 = jnp.dot(x_bf, w_pre_ref[...], preferred_element_type=f32) + b_pre_ref[...]

    # ---- depthwise 3x3 (BN1 folded) + hardswish ----------------------------
    z = z1.reshape(H, W, C)                                  # lane dim untouched
    zc_w = jnp.zeros((H, 1, C), f32)
    zm = jnp.concatenate([zc_w, z[:, :W - 1, :]], axis=1)    # z[h, w-1] (0 at w=0)
    zp = jnp.concatenate([z[:, 1:, :], zc_w], axis=1)        # z[h, w+1] (0 at w=W-1)

    def row_tap(k):  # contribution of dw-kernel row k, evaluated at unshifted h
        return (zm * w_dw_ref[3 * k + 0]
                + z * w_dw_ref[3 * k + 1]
                + zp * w_dw_ref[3 * k + 2])

    r0, r1, r2 = row_tap(0), row_tap(1), row_tap(2)
    zc_h = jnp.zeros((1, W, C), f32)
    y = (b_dw_ref[...] + r1
         + jnp.concatenate([zc_h, r0[:H - 1]], axis=0)       # r0[h-1]
         + jnp.concatenate([r2[1:], zc_h], axis=0))          # r2[h+1]
    z2 = y * jnp.clip(y + 3.0, 0.0, 6.0) * (1.0 / 6.0)       # hardswish (f32)
    z2 = z2.reshape(HW, C)

    # ---- 1x1 conv + BN2 (folded, no act) + inner residual ------------------
    z3 = (jnp.dot(z2.astype(jnp.bfloat16), w_pw_ref[...],
                  preferred_element_type=f32)
          + b_pw_ref[...] + z1)

    # ---- SqueezeExcite gate (in-kernel channel mean, no HBM round trip) ----
    m = jnp.sum(z3, axis=0, keepdims=True) * (1.0 / HW)      # (1, C)
    m8 = jnp.broadcast_to(m, (8, C))                         # pad sublanes to 8
    h8 = jnp.maximum(
        jnp.dot(m8.astype(jnp.bfloat16), w_se1_ref[...],
                preferred_element_type=f32) + b_se1_ref[...], 0.0)
    g8 = jax.nn.sigmoid(
        jnp.dot(h8.astype(jnp.bfloat16), w_se2_ref[...],
                preferred_element_type=f32) + b_se2_ref[...])
    gate = g8[0:1, :]                                        # (1, C)

    # ---- post 1x1 conv + outer MBConv identity skip ------------------------
    zs = (z3 * gate).astype(jnp.bfloat16)
    o_ref[...] = (jnp.dot(zs, w_post_ref[...], preferred_element_type=f32)
                  + b_post_ref[...] + x_ref[...])


# ----------------------------- pallas_call glue ----------------------------- #

def _bn_fold(gamma, beta, mean, var, eps=1e-5):
    s = gamma / jnp.sqrt(var + eps)
    return s, beta - mean * s


def _prepare_params(params):
    """Fold eval-mode BN into adjacent convs; pre-cast matmul weights to bf16."""
    C = params["w_pre"].shape[0]
    Crd = params["w_se1"].shape[1]
    s0, t0 = _bn_fold(*params["bn0"])
    s1, t1 = _bn_fold(*params["bn1"])
    s2, t2 = _bn_fold(*params["bn2"])

    w_pre = (params["w_pre"] * s0[:, None]).astype(jnp.bfloat16)
    b_pre = (params["b_pre"] + t0 @ params["w_pre"]).reshape(1, C)
    w_dw = (params["w_dw"] * s1).reshape(9, 1, C)            # f32 (VPU path)
    b_dw = t1.reshape(1, 1, C)
    w_pw = (params["w_pw"] * s2[None, :]).astype(jnp.bfloat16)
    b_pw = t2.reshape(1, C)
    w_se1 = params["w_se1"].astype(jnp.bfloat16)
    b_se1 = params["b_se1"].reshape(1, Crd)
    w_se2 = params["w_se2"].astype(jnp.bfloat16)
    b_se2 = params["b_se2"].reshape(1, C)
    w_post = params["w_post"].astype(jnp.bfloat16)
    b_post = params["b_post"].reshape(1, C)
    return (w_pre, b_pre, w_dw, b_dw, w_pw, b_pw,
            w_se1, b_se1, w_se2, b_se2, w_post, b_post)


def mbconv_stage(x_nhwc, prepared):
    """x_nhwc: (N, H, W, C) f32 -> (N, H, W, C) f32. One fused pallas_call."""
    N, H, W, C = x_nhwc.shape
    HW = H * W
    xf = x_nhwc.reshape(N, HW, C)
    (w_pre, b_pre, w_dw, b_dw, w_pw, b_pw,
     w_se1, b_se1, w_se2, b_se2, w_post, b_post) = prepared
    Crd = w_se1.shape[1]

    def const_spec(shape):  # weight/bias: DMA'd once, VMEM-resident over N steps
        return pl.BlockSpec(shape, lambda n, _s=shape: (0,) * len(_s))

    kern = functools.partial(_mbconv_fused_kernel, H=H, W=W)
    out = pl.pallas_call(
        kern,
        grid=(N,),
        in_specs=[
            pl.BlockSpec((None, HW, C), lambda n: (n, 0, 0)),   # x
            const_spec((C, C)), const_spec((1, C)),             # pre 1x1
            const_spec((9, 1, C)), const_spec((1, 1, C)),       # dw 3x3 (folded)
            const_spec((C, C)), const_spec((1, C)),             # pw 1x1
            const_spec((C, Crd)), const_spec((1, Crd)),         # SE reduce
            const_spec((Crd, C)), const_spec((1, C)),           # SE expand
            const_spec((C, C)), const_spec((1, C)),             # post 1x1
        ],
        out_specs=pl.BlockSpec((None, HW, C), lambda n: (n, 0, 0)),
        out_shape=jax.ShapeDtypeStruct((N, HW, C), jnp.float32),
        compiler_params=pltpu.CompilerParams(
            dimension_semantics=("parallel",)),
    )(xf, w_pre, b_pre, w_dw, b_dw, w_pw, b_pw,
      w_se1, b_se1, w_se2, b_se2, w_post, b_post)
    return out.reshape(N, H, W, C)


@jax.jit
def patch_embed_stage_forward(x_nchw, params):
    x = jnp.transpose(x_nchw, (0, 2, 3, 1)).astype(jnp.float32)   # NHWC
    out = mbconv_stage(x, _prepare_params(params))
    return jnp.transpose(out, (0, 3, 1, 2))                       # back to NCHW


# ------------------------------ init & reference ---------------------------- #

def init_params(key, C):
    Crd = max(1, C // 4)   # SqueezeExcite rd_ratio=0.25
    ks = jax.random.split(key, 10)
    nrm = lambda k, s: 0.02 * jax.random.normal(k, s, jnp.float32)
    ones, zeros = jnp.ones((C,), jnp.float32), jnp.zeros((C,), jnp.float32)
    return dict(
        # BatchNorm2d params at PyTorch defaults (eval mode)
        bn0=(ones, zeros, zeros, ones),
        bn1=(ones, zeros, zeros, ones),
        bn2=(ones, zeros, zeros, ones),
        w_pre=nrm(ks[0], (C, C)), b_pre=nrm(ks[1], (C,)),
        w_dw=nrm(ks[2], (3, 3, C)),                    # depthwise (no bias)
        w_pw=nrm(ks[3], (C, C)),                       # pointwise (no bias)
        w_se1=nrm(ks[4], (C, Crd)), b_se1=nrm(ks[5], (Crd,)),
        w_se2=nrm(ks[6], (Crd, C)), b_se2=nrm(ks[7], (C,)),
        w_post=nrm(ks[8], (C, C)), b_post=nrm(ks[9], (C,)),
    )


def _reference_forward(x_nchw, params):
    """Pure-JAX reference with the same bf16-matmul precision choices."""
    N, C, H, W = x_nchw.shape
    x = jnp.transpose(x_nchw, (0, 2, 3, 1)).astype(jnp.float32).reshape(N, H * W, C)
    (w_pre, b_pre, w_dw, b_dw, w_pw, b_pw,
     w_se1, b_se1, w_se2, b_se2, w_post, b_post) = _prepare_params(params)

    def dot(a, w):
        return jnp.dot(a.astype(jnp.bfloat16), w, preferred_element_type=jnp.float32)

    z1 = dot(x, w_pre) + b_pre
    zh = jnp.pad(z1.reshape(N, H, W, C), ((0, 0), (1, 1), (1, 1), (0, 0)))
    wd = w_dw.reshape(3, 3, C)
    y = jnp.zeros((N, H, W, C), jnp.float32) + b_dw.reshape(1, 1, 1, C)
    for kh in range(3):
        for kw in range(3):
            y = y + zh[:, kh:kh + H, kw:kw + W, :] * wd[kh, kw]
    z2 = (y * jnp.clip(y + 3.0, 0.0, 6.0) / 6.0).reshape(N, H * W, C)
    z3 = dot(z2, w_pw) + b_pw + z1
    m = jnp.mean(z3, axis=1, keepdims=True)
    h = jnp.maximum(dot(m, w_se1) + b_se1, 0.0)
    gate = jax.nn.sigmoid(dot(h, w_se2) + b_se2)
    out = dot(z3 * gate, w_post) + b_post + x
    return jnp.transpose(out.reshape(N, H, W, C), (0, 3, 1, 2))


if __name__ == "__main__":
    N, C, H, W = 2, 128, 16, 16          # embed_dim=128, isPool=False (stride 1)
    kx, kp = jax.random.split(jax.random.PRNGKey(0))
    x = jax.random.normal(kx, (N, C, H, W), jnp.float32)
    params = init_params(kp, C)

    out = patch_embed_stage_forward(x, params)
    jax.block_until_ready(out)
    assert out.shape == (N, C, H, W) and out.dtype == jnp.float32

    ref = _reference_forward(x, params)
    err = float(jnp.max(jnp.abs(out - ref)))
    assert err < 3e-2, f"mismatch vs reference: max abs err {err}"
    print("KERNEL_OK")
</pallas_src>

<mosaic_0001>
module attributes {stable_mosaic.version = 11 : i64} {
  func.func @_mbconv_fused_kernel(%arg0: i32, %arg1: memref<1x256x128xf32, #tpu.memory_space<vmem>>, %arg2: memref<128x128xbf16, #tpu.memory_space<vmem>>, %arg3: memref<1x128xf32, #tpu.memory_space<vmem>>, %arg4: memref<9x1x128xf32, #tpu.memory_space<vmem>>, %arg5: memref<1x1x128xf32, #tpu.memory_space<vmem>>, %arg6: memref<128x128xbf16, #tpu.memory_space<vmem>>, %arg7: memref<1x128xf32, #tpu.memory_space<vmem>>, %arg8: memref<128x32xbf16, #tpu.memory_space<vmem>>, %arg9: memref<1x32xf32, #tpu.memory_space<vmem>>, %arg10: memref<32x128xbf16, #tpu.memory_space<vmem>>, %arg11: memref<1x128xf32, #tpu.memory_space<vmem>>, %arg12: memref<128x128xbf16, #tpu.memory_space<vmem>>, %arg13: memref<1x128xf32, #tpu.memory_space<vmem>>, %arg14: memref<1x256x128xf32, #tpu.memory_space<vmem>>) attributes {dimension_semantics = [#tpu.dimension_semantics<parallel>], iteration_bounds = array<i64: 2>, scalar_prefetch = 0 : i64, scratch_operands = 0 : i64, tpu.core_type = #tpu.core_type<tc>, window_params = [{transform_indices = @transform_0, window_bounds = array<i64: 1, 256, 128>}, {pipeline_mode = #tpu.pipeline_mode<synchronous>, transform_indices = @transform_1, window_bounds = array<i64: 128, 128>}, {pipeline_mode = #tpu.pipeline_mode<synchronous>, transform_indices = @transform_2, window_bounds = array<i64: 1, 128>}, {pipeline_mode = #tpu.pipeline_mode<synchronous>, transform_indices = @transform_3, window_bounds = array<i64: 9, 1, 128>}, {pipeline_mode = #tpu.pipeline_mode<synchronous>, transform_indices = @transform_4, window_bounds = array<i64: 1, 1, 128>}, {pipeline_mode = #tpu.pipeline_mode<synchronous>, transform_indices = @transform_5, window_bounds = array<i64: 128, 128>}, {pipeline_mode = #tpu.pipeline_mode<synchronous>, transform_indices = @transform_6, window_bounds = array<i64: 1, 128>}, {pipeline_mode = #tpu.pipeline_mode<synchronous>, transform_indices = @transform_7, window_bounds = array<i64: 128, 32>}, {pipeline_mode = #tpu.pipeline_mode<synchronous>, transform_indices = @transform_8, window_bounds = array<i64: 1, 32>}, {pipeline_mode = #tpu.pipeline_mode<synchronous>, transform_indices = @transform_9, window_bounds = array<i64: 32, 128>}, {pipeline_mode = #tpu.pipeline_mode<synchronous>, transform_indices = @transform_10, window_bounds = array<i64: 1, 128>}, {pipeline_mode = #tpu.pipeline_mode<synchronous>, transform_indices = @transform_11, window_bounds = array<i64: 128, 128>}, {pipeline_mode = #tpu.pipeline_mode<synchronous>, transform_indices = @transform_12, window_bounds = array<i64: 1, 128>}, {transform_indices = @transform_13, window_bounds = array<i64: 1, 256, 128>}]} {
    %c0 = arith.constant 0 : index
    %c0_0 = arith.constant 0 : index
    %c0_1 = arith.constant 0 : index
    %0 = vector.load %arg1[%c0, %c0_0, %c0_1] : memref<1x256x128xf32, #tpu.memory_space<vmem>>, vector<1x256x128xf32>
    %1 = vector.shape_cast %0 : vector<1x256x128xf32> to vector<256x128xf32>
    %2 = arith.truncf %1 : vector<256x128xf32> to vector<256x128xbf16>
    %c0_2 = arith.constant 0 : index
    %c0_3 = arith.constant 0 : index
    %3 = vector.load %arg2[%c0_2, %c0_3] : memref<128x128xbf16, #tpu.memory_space<vmem>>, vector<128x128xbf16>
    %cst = arith.constant dense<0.000000e+00> : vector<256x128xf32>
    %4 = tpu.matmul %2, %3, %cst {dimension_numbers = #tpu.dot_dimension_numbers<[1], [0], [0], [1], [0, 0, 1, 1], [], []>} : vector<256x128xbf16>, vector<128x128xbf16>, vector<256x128xf32> -> vector<256x128xf32>
    %c0_4 = arith.constant 0 : index
    %c0_5 = arith.constant 0 : index
    %5 = vector.load %arg3[%c0_4, %c0_5] : memref<1x128xf32, #tpu.memory_space<vmem>>, vector<1x128xf32>
    %6 = vector.broadcast %5 : vector<1x128xf32> to vector<256x128xf32>
    %7 = arith.addf %4, %6 : vector<256x128xf32>
    %8 = vector.shape_cast %7 : vector<256x128xf32> to vector<16x16x128xf32>
    %cst_6 = arith.constant 0.000000e+00 : f32
    %9 = vector.broadcast %cst_6 : f32 to vector<16x1x128xf32>
    %10 = vector.extract_strided_slice %8 {offsets = [0, 0, 0], sizes = [16, 15, 128], strides = [1, 1, 1]} : vector<16x16x128xf32> to vector<16x15x128xf32>
    %11 = tpu.concatenate %9, %10 in 1 : vector<16x1x128xf32>, vector<16x15x128xf32> -> vector<16x16x128xf32>
    %12 = vector.extract_strided_slice %8 {offsets = [0, 1, 0], sizes = [16, 15, 128], strides = [1, 1, 1]} : vector<16x16x128xf32> to vector<16x15x128xf32>
    %13 = tpu.concatenate %12, %9 in 1 : vector<16x15x128xf32>, vector<16x1x128xf32> -> vector<16x16x128xf32>
    %c0_7 = arith.constant 0 : index
    %c0_8 = arith.constant 0 : index
    %c0_9 = arith.constant 0 : index
    %14 = vector.load %arg4[%c0_7, %c0_8, %c0_9] : memref<9x1x128xf32, #tpu.memory_space<vmem>>, vector<1x1x128xf32>
    %15 = vector.shape_cast %14 : vector<1x1x128xf32> to vector<1x128xf32>
    %16 = vector.shape_cast %15 : vector<1x128xf32> to vector<1x1x128xf32>
    %17 = vector.broadcast %16 : vector<1x1x128xf32> to vector<16x16x128xf32>
    %18 = arith.mulf %11, %17 : vector<16x16x128xf32>
    %c1 = arith.constant 1 : index
    %c0_10 = arith.constant 0 : index
    %c0_11 = arith.constant 0 : index
    %19 = vector.load %arg4[%c1, %c0_10, %c0_11] : memref<9x1x128xf32, #tpu.memory_space<vmem>>, vector<1x1x128xf32>
    %20 = vector.shape_cast %19 : vector<1x1x128xf32> to vector<1x128xf32>
    %21 = vector.shape_cast %20 : vector<1x128xf32> to vector<1x1x128xf32>
    %22 = vector.broadcast %21 : vector<1x1x128xf32> to vector<16x16x128xf32>
    %23 = arith.mulf %8, %22 : vector<16x16x128xf32>
    %24 = arith.addf %18, %23 : vector<16x16x128xf32>
    %c2 = arith.constant 2 : index
    %c0_12 = arith.constant 0 : index
    %c0_13 = arith.constant 0 : index
    %25 = vector.load %arg4[%c2, %c0_12, %c0_13] : memref<9x1x128xf32, #tpu.memory_space<vmem>>, vector<1x1x128xf32>
    %26 = vector.shape_cast %25 : vector<1x1x128xf32> to vector<1x128xf32>
    %27 = vector.shape_cast %26 : vector<1x128xf32> to vector<1x1x128xf32>
    %28 = vector.broadcast %27 : vector<1x1x128xf32> to vector<16x16x128xf32>
    %29 = arith.mulf %13, %28 : vector<16x16x128xf32>
    %30 = arith.addf %24, %29 : vector<16x16x128xf32>
    %c3 = arith.constant 3 : index
    %c0_14 = arith.constant 0 : index
    %c0_15 = arith.constant 0 : index
    %31 = vector.load %arg4[%c3, %c0_14, %c0_15] : memref<9x1x128xf32, #tpu.memory_space<vmem>>, vector<1x1x128xf32>
    %32 = vector.shape_cast %31 : vector<1x1x128xf32> to vector<1x128xf32>
    %33 = vector.shape_cast %32 : vector<1x128xf32> to vector<1x1x128xf32>
    %34 = vector.broadcast %33 : vector<1x1x128xf32> to vector<16x16x128xf32>
    %35 = arith.mulf %11, %34 : vector<16x16x128xf32>
    %c4 = arith.constant 4 : index
    %c0_16 = arith.constant 0 : index
    %c0_17 = arith.constant 0 : index
    %36 = vector.load %arg4[%c4, %c0_16, %c0_17] : memref<9x1x128xf32, #tpu.memory_space<vmem>>, vector<1x1x128xf32>
    %37 = vector.shape_cast %36 : vector<1x1x128xf32> to vector<1x128xf32>
    %38 = vector.shape_cast %37 : vector<1x128xf32> to vector<1x1x128xf32>
    %39 = vector.broadcast %38 : vector<1x1x128xf32> to vector<16x16x128xf32>
    %40 = arith.mulf %8, %39 : vector<16x16x128xf32>
    %41 = arith.addf %35, %40 : vector<16x16x128xf32>
    %c5 = arith.constant 5 : index
    %c0_18 = arith.constant 0 : index
    %c0_19 = arith.constant 0 : index
    %42 = vector.load %arg4[%c5, %c0_18, %c0_19] : memref<9x1x128xf32, #tpu.memory_space<vmem>>, vector<1x1x128xf32>
    %43 = vector.shape_cast %42 : vector<1x1x128xf32> to vector<1x128xf32>
    %44 = vector.shape_cast %43 : vector<1x128xf32> to vector<1x1x128xf32>
    %45 = vector.broadcast %44 : vector<1x1x128xf32> to vector<16x16x128xf32>
    %46 = arith.mulf %13, %45 : vector<16x16x128xf32>
    %47 = arith.addf %41, %46 : vector<16x16x128xf32>
    %c6 = arith.constant 6 : index
    %c0_20 = arith.constant 0 : index
    %c0_21 = arith.constant 0 : index
    %48 = vector.load %arg4[%c6, %c0_20, %c0_21] : memref<9x1x128xf32, #tpu.memory_space<vmem>>, vector<1x1x128xf32>
    %49 = vector.shape_cast %48 : vector<1x1x128xf32> to vector<1x128xf32>
    %50 = vector.shape_cast %49 : vector<1x128xf32> to vector<1x1x128xf32>
    %51 = vector.broadcast %50 : vector<1x1x128xf32> to vector<16x16x128xf32>
    %52 = arith.mulf %11, %51 : vector<16x16x128xf32>
    %c7 = arith.constant 7 : index
    %c0_22 = arith.constant 0 : index
    %c0_23 = arith.constant 0 : index
    %53 = vector.load %arg4[%c7, %c0_22, %c0_23] : memref<9x1x128xf32, #tpu.memory_space<vmem>>, vector<1x1x128xf32>
    %54 = vector.shape_cast %53 : vector<1x1x128xf32> to vector<1x128xf32>
    %55 = vector.shape_cast %54 : vector<1x128xf32> to vector<1x1x128xf32>
    %56 = vector.broadcast %55 : vector<1x1x128xf32> to vector<16x16x128xf32>
    %57 = arith.mulf %8, %56 : vector<16x16x128xf32>
    %58 = arith.addf %52, %57 : vector<16x16x128xf32>
    %c8 = arith.constant 8 : index
    %c0_24 = arith.constant 0 : index
    %c0_25 = arith.constant 0 : index
    %59 = vector.load %arg4[%c8, %c0_24, %c0_25] : memref<9x1x128xf32, #tpu.memory_space<vmem>>, vector<1x1x128xf32>
    %60 = vector.shape_cast %59 : vector<1x1x128xf32> to vector<1x128xf32>
    %61 = vector.shape_cast %60 : vector<1x128xf32> to vector<1x1x128xf32>
    %62 = vector.broadcast %61 : vector<1x1x128xf32> to vector<16x16x128xf32>
    %63 = arith.mulf %13, %62 : vector<16x16x128xf32>
    %64 = arith.addf %58, %63 : vector<16x16x128xf32>
    %cst_26 = arith.constant 0.000000e+00 : f32
    %65 = vector.broadcast %cst_26 : f32 to vector<1x16x128xf32>
    %c0_27 = arith.constant 0 : index
    %c0_28 = arith.constant 0 : index
    %c0_29 = arith.constant 0 : index
    %66 = vector.load %arg5[%c0_27, %c0_28, %c0_29] : memref<1x1x128xf32, #tpu.memory_space<vmem>>, vector<1x1x128xf32>
    %67 = vector.broadcast %66 : vector<1x1x128xf32> to vector<16x16x128xf32>
    %68 = arith.addf %67, %47 : vector<16x16x128xf32>
    %69 = vector.extract_strided_slice %30 {offsets = [0, 0, 0], sizes = [15, 16, 128], strides = [1, 1, 1]} : vector<16x16x128xf32> to vector<15x16x128xf32>
    %70 = tpu.concatenate %65, %69 in 0 : vector<1x16x128xf32>, vector<15x16x128xf32> -> vector<16x16x128xf32>
    %71 = arith.addf %68, %70 : vector<16x16x128xf32>
    %72 = vector.extract_strided_slice %64 {offsets = [1, 0, 0], sizes = [15, 16, 128], strides = [1, 1, 1]} : vector<16x16x128xf32> to vector<15x16x128xf32>
    %73 = tpu.concatenate %72, %65 in 0 : vector<15x16x128xf32>, vector<1x16x128xf32> -> vector<16x16x128xf32>
    %74 = arith.addf %71, %73 : vector<16x16x128xf32>
    %cst_30 = arith.constant 3.000000e+00 : f32
    %75 = vector.broadcast %cst_30 : f32 to vector<16x16x128xf32>
    %76 = arith.addf %74, %75 : vector<16x16x128xf32>
    %cst_31 = arith.constant 0.000000e+00 : f32
    %cst_32 = arith.constant 6.000000e+00 : f32
    %77 = vector.broadcast %cst_31 : f32 to vector<16x16x128xf32>
    %78 = arith.maximumf %77, %76 : vector<16x16x128xf32>
    %79 = vector.broadcast %cst_32 : f32 to vector<16x16x128xf32>
    %80 = arith.minimumf %79, %78 : vector<16x16x128xf32>
    %81 = arith.mulf %74, %80 : vector<16x16x128xf32>
    %cst_33 = arith.constant 0.166666672 : f32
    %82 = vector.broadcast %cst_33 : f32 to vector<16x16x128xf32>
    %83 = arith.mulf %81, %82 : vector<16x16x128xf32>
    %84 = vector.shape_cast %83 : vector<16x16x128xf32> to vector<256x128xf32>
    %85 = arith.truncf %84 : vector<256x128xf32> to vector<256x128xbf16>
    %c0_34 = arith.constant 0 : index
    %c0_35 = arith.constant 0 : index
    %86 = vector.load %arg6[%c0_34, %c0_35] : memref<128x128xbf16, #tpu.memory_space<vmem>>, vector<128x128xbf16>
    %cst_36 = arith.constant dense<0.000000e+00> : vector<256x128xf32>
    %87 = tpu.matmul %85, %86, %cst_36 {dimension_numbers = #tpu.dot_dimension_numbers<[1], [0], [0], [1], [0, 0, 1, 1], [], []>} : vector<256x128xbf16>, vector<128x128xbf16>, vector<256x128xf32> -> vector<256x128xf32>
    %c0_37 = arith.constant 0 : index
    %c0_38 = arith.constant 0 : index
    %88 = vector.load %arg7[%c0_37, %c0_38] : memref<1x128xf32, #tpu.memory_space<vmem>>, vector<1x128xf32>
    %89 = vector.broadcast %88 : vector<1x128xf32> to vector<256x128xf32>
    %90 = arith.addf %87, %89 : vector<256x128xf32>
    %91 = arith.addf %90, %7 : vector<256x128xf32>
    %cst_39 = arith.constant dense<0.000000e+00> : vector<128xf32>
    %92 = vector.multi_reduction <add>, %91, %cst_39 [0] : vector<256x128xf32> to vector<128xf32>
    %93 = vector.shape_cast %92 : vector<128xf32> to vector<1x128xf32>
    %cst_40 = arith.constant 3.906250e-03 : f32
    %94 = vector.broadcast %cst_40 : f32 to vector<1x128xf32>
    %95 = arith.mulf %93, %94 : vector<1x128xf32>
    %96 = vector.shape_cast %95 : vector<1x128xf32> to vector<1x128xf32>
    %97 = vector.broadcast %96 : vector<1x128xf32> to vector<8x128xf32>
    %98 = arith.truncf %97 : vector<8x128xf32> to vector<8x128xbf16>
    %c0_41 = arith.constant 0 : index
    %c0_42 = arith.constant 0 : index
    %99 = vector.load %arg8[%c0_41, %c0_42] : memref<128x32xbf16, #tpu.memory_space<vmem>>, vector<128x32xbf16>
    %cst_43 = arith.constant dense<0.000000e+00> : vector<8x32xf32>
    %100 = tpu.matmul %98, %99, %cst_43 {dimension_numbers = #tpu.dot_dimension_numbers<[1], [0], [0], [1], [0, 0, 1, 1], [], []>} : vector<8x128xbf16>, vector<128x32xbf16>, vector<8x32xf32> -> vector<8x32xf32>
    %c0_44 = arith.constant 0 : index
    %c0_45 = arith.constant 0 : index
    %101 = vector.load %arg9[%c0_44, %c0_45] : memref<1x32xf32, #tpu.memory_space<vmem>>, vector<1x32xf32>
    %102 = vector.broadcast %101 : vector<1x32xf32> to vector<8x32xf32>
    %103 = arith.addf %100, %102 : vector<8x32xf32>
    %cst_46 = arith.constant 0.000000e+00 : f32
    %104 = vector.broadcast %cst_46 : f32 to vector<8x32xf32>
    %105 = arith.maximumf %103, %104 : vector<8x32xf32>
    %106 = arith.truncf %105 : vector<8x32xf32> to vector<8x32xbf16>
    %c0_47 = arith.constant 0 : index
    %c0_48 = arith.constant 0 : index
    %107 = vector.load %arg10[%c0_47, %c0_48] : memref<32x128xbf16, #tpu.memory_space<vmem>>, vector<32x128xbf16>
    %cst_49 = arith.constant dense<0.000000e+00> : vector<8x128xf32>
    %108 = tpu.matmul %106, %107, %cst_49 {dimension_numbers = #tpu.dot_dimension_numbers<[1], [0], [0], [1], [0, 0, 1, 1], [], []>} : vector<8x32xbf16>, vector<32x128xbf16>, vector<8x128xf32> -> vector<8x128xf32>
    %c0_50 = arith.constant 0 : index
    %c0_51 = arith.constant 0 : index
    %109 = vector.load %arg11[%c0_50, %c0_51] : memref<1x128xf32, #tpu.memory_space<vmem>>, vector<1x128xf32>
    %110 = vector.broadcast %109 : vector<1x128xf32> to vector<8x128xf32>
    %111 = arith.addf %108, %110 : vector<8x128xf32>
    %112 = arith.negf %111 : vector<8x128xf32>
    %113 = math.exp %112 : vector<8x128xf32>
    %cst_52 = arith.constant 1.000000e+00 : f32
    %114 = vector.broadcast %cst_52 : f32 to vector<8x128xf32>
    %115 = arith.addf %114, %113 : vector<8x128xf32>
    %116 = arith.divf %114, %115 : vector<8x128xf32>
    %117 = vector.extract_strided_slice %116 {offsets = [0, 0], sizes = [1, 128], strides = [1, 1]} : vector<8x128xf32> to vector<1x128xf32>
    %118 = vector.broadcast %117 : vector<1x128xf32> to vector<256x128xf32>
    %119 = arith.mulf %91, %118 : vector<256x128xf32>
    %120 = arith.truncf %119 : vector<256x128xf32> to vector<256x128xbf16>
    %c0_53 = arith.constant 0 : index
    %c0_54 = arith.constant 0 : index
    %121 = vector.load %arg12[%c0_53, %c0_54] : memref<128x128xbf16, #tpu.memory_space<vmem>>, vector<128x128xbf16>
    %cst_55 = arith.constant dense<0.000000e+00> : vector<256x128xf32>
    %122 = tpu.matmul %120, %121, %cst_55 {dimension_numbers = #tpu.dot_dimension_numbers<[1], [0], [0], [1], [0, 0, 1, 1], [], []>} : vector<256x128xbf16>, vector<128x128xbf16>, vector<256x128xf32> -> vector<256x128xf32>
    %c0_56 = arith.constant 0 : index
    %c0_57 = arith.constant 0 : index
    %123 = vector.load %arg13[%c0_56, %c0_57] : memref<1x128xf32, #tpu.memory_space<vmem>>, vector<1x128xf32>
    %124 = vector.broadcast %123 : vector<1x128xf32> to vector<256x128xf32>
    %125 = arith.addf %122, %124 : vector<256x128xf32>
    %c0_58 = arith.constant 0 : index
    %c0_59 = arith.constant 0 : index
    %c0_60 = arith.constant 0 : index
    %126 = vector.load %arg1[%c0_58, %c0_59, %c0_60] : memref<1x256x128xf32, #tpu.memory_space<vmem>>, vector<1x256x128xf32>
    %127 = vector.shape_cast %126 : vector<1x256x128xf32> to vector<256x128xf32>
    %128 = arith.addf %125, %127 : vector<256x128xf32>
    %c0_61 = arith.constant 0 : index
    %c0_62 = arith.constant 0 : index
    %c0_63 = arith.constant 0 : index
    %129 = vector.load %arg14[%c0_61, %c0_62, %c0_63] : memref<1x256x128xf32, #tpu.memory_space<vmem>>, vector<1x256x128xf32>
    %130 = vector.shape_cast %129 : vector<1x256x128xf32> to vector<256x128xf32>
    %131 = vector.shape_cast %128 : vector<256x128xf32> to vector<1x256x128xf32>
    tpu.vector_store %arg14[%c0_61, %c0_62, %c0_63], %131 {strides = array<i32>} : memref<1x256x128xf32, #tpu.memory_space<vmem>>, vector<1x256x128xf32>,
    return
  }
  func.func @transform_0(%arg0: i32) -> (i32, i32, i32) {
    %c0_i32 = arith.constant 0 : i32
    %c0_i32_0 = arith.constant 0 : i32
    %c0_i32_1 = arith.constant 0 : i32
    return %arg0, %c0_i32, %c0_i32_0 : i32, i32, i32
  }
  func.func @transform_1(%arg0: i32) -> (i32, i32) {
    %c0_i32 = arith.constant 0 : i32
    %c0_i32_0 = arith.constant 0 : i32
    %c0_i32_1 = arith.constant 0 : i32
    return %c0_i32, %c0_i32_0 : i32, i32
  }
  func.func @transform_2(%arg0: i32) -> (i32, i32) {
    %c0_i32 = arith.constant 0 : i32
    %c0_i32_0 = arith.constant 0 : i32
    %c0_i32_1 = arith.constant 0 : i32
    return %c0_i32, %c0_i32_0 : i32, i32
  }
  func.func @transform_3(%arg0: i32) -> (i32, i32, i32) {
    %c0_i32 = arith.constant 0 : i32
    %c0_i32_0 = arith.constant 0 : i32
    %c0_i32_1 = arith.constant 0 : i32
    %c0_i32_2 = arith.constant 0 : i32
    return %c0_i32, %c0_i32_0, %c0_i32_1 : i32, i32, i32
  }
  func.func @transform_4(%arg0: i32) -> (i32, i32, i32) {
    %c0_i32 = arith.constant 0 : i32
    %c0_i32_0 = arith.constant 0 : i32
    %c0_i32_1 = arith.constant 0 : i32
    %c0_i32_2 = arith.constant 0 : i32
    return %c0_i32, %c0_i32_0, %c0_i32_1 : i32, i32, i32
  }
  func.func @transform_5(%arg0: i32) -> (i32, i32) {
    %c0_i32 = arith.constant 0 : i32
    %c0_i32_0 = arith.constant 0 : i32
    %c0_i32_1 = arith.constant 0 : i32
    return %c0_i32, %c0_i32_0 : i32, i32
  }
  func.func @transform_6(%arg0: i32) -> (i32, i32) {
    %c0_i32 = arith.constant 0 : i32
    %c0_i32_0 = arith.constant 0 : i32
    %c0_i32_1 = arith.constant 0 : i32
    return %c0_i32, %c0_i32_0 : i32, i32
  }
  func.func @transform_7(%arg0: i32) -> (i32, i32) {
    %c0_i32 = arith.constant 0 : i32
    %c0_i32_0 = arith.constant 0 : i32
    %c0_i32_1 = arith.constant 0 : i32
    return %c0_i32, %c0_i32_0 : i32, i32
  }
  func.func @transform_8(%arg0: i32) -> (i32, i32) {
    %c0_i32 = arith.constant 0 : i32
    %c0_i32_0 = arith.constant 0 : i32
    %c0_i32_1 = arith.constant 0 : i32
    return %c0_i32, %c0_i32_0 : i32, i32
  }
  func.func @transform_9(%arg0: i32) -> (i32, i32) {
    %c0_i32 = arith.constant 0 : i32
    %c0_i32_0 = arith.constant 0 : i32
    %c0_i32_1 = arith.constant 0 : i32
    return %c0_i32, %c0_i32_0 : i32, i32
  }
  func.func @transform_10(%arg0: i32) -> (i32, i32) {
    %c0_i32 = arith.constant 0 : i32
    %c0_i32_0 = arith.constant 0 : i32
    %c0_i32_1 = arith.constant 0 : i32
    return %c0_i32, %c0_i32_0 : i32, i32
  }
  func.func @transform_11(%arg0: i32) -> (i32, i32) {
    %c0_i32 = arith.constant 0 : i32
    %c0_i32_0 = arith.constant 0 : i32
    %c0_i32_1 = arith.constant 0 : i32
    return %c0_i32, %c0_i32_0 : i32, i32
  }
  func.func @transform_12(%arg0: i32) -> (i32, i32) {
    %c0_i32 = arith.constant 0 : i32
    %c0_i32_0 = arith.constant 0 : i32
    %c0_i32_1 = arith.constant 0 : i32
    return %c0_i32, %c0_i32_0 : i32, i32
  }
  func.func @transform_13(%arg0: i32) -> (i32, i32, i32) {
    %c0_i32 = arith.constant 0 : i32
    %c0_i32_0 = arith.constant 0 : i32
    %c0_i32_1 = arith.constant 0 : i32
    return %arg0, %c0_i32, %c0_i32_0 : i32, i32, i32
  }
}

</mosaic_0001>

<bundles_post_ra>
// kernel: patch_embed_stage_forward.1
= control target key start
LH: loop header
LB: loop body
LE: loop exit
PB: predicated region body
PF: predicated region fallthrough
CT: control target
= control target key end

     0   :  { %18 = vsyncpa [#allocation3], 0  ;;  %s5248_s0 = inlined_call_operand.vmem [shape: f32[2,256,128], index: 0, kind: input, shape index: {}]   ;;  %s5249_s1 = inlined_call_operand.vmem [shape: bf16[128,128], index: 1, kind: input, shape index: {}]   ;;  %s5250_s2 = inlined_call_operand.vmem [shape: f32[1,128], index: 2, kind: input, shape index: {}]   ;;  %s5251_s3 = inlined_call_operand.vmem [shape: f32[9,1,128], index: 3, kind: input, shape index: {}]   ;;  %s5252_s4 = inlined_call_operand.vmem [shape: f32[1,1,128], index: 4, kind: input, shape index: {}]   ;;  %s5253_s5 = inlined_call_operand.vmem [shape: bf16[128,128], index: 5, kind: input, shape index: {}]   ;;  %s5254_s6 = inlined_call_operand.vmem [shape: f32[1,128], index: 6, kind: input, shape index: {}]   ;;  %s5255_s7 = inlined_call_operand.vmem [shape: bf16[128,32], index: 7, kind: input, shape index: {}]   ;;  %s5256_s8 = inlined_call_operand.vmem [shape: f32[1,32], index: 8, kind: input, shape index: {}]   ;;  %s5257_s9 = inlined_call_operand.vmem [shape: bf16[32,128], index: 9, kind: input, shape index: {}]   ;;  %s5258_s10 = inlined_call_operand.hbm [shape: f32[1,128], index: 10, kind: input, shape index: {}]   ;;  %s5259_s11 = inlined_call_operand.vmem [shape: bf16[128,128], index: 11, kind: input, shape index: {}]   ;;  %s5260_s12 = inlined_call_operand.hbm [shape: f32[1,128], index: 12, kind: input, shape index: {}]   ;;  %s5261_s13 = inlined_call_operand.hbm [shape: f32[2,256,128], index: 13, kind: output, shape index: {}]  }
   0x1   :  { %19 = vsyncpa [#allocation6], 0 }
   0x2   :  { %20 = vsyncpa [#allocation4], 0 }
   0x3   :  { %22 = vsyncpa [#allocation4 + $0x1], 0  ;;  %s3415_s25 = smov 0   ;;  %s3417_s26 = smov 0  }
   0x4   :  { %s3419_s27 = smov 0   ;;  %s3421_s28 = smov 0  }
   0x5 LB: > { %5300 = sst [smem:[#allocation11_spill]] %s3324_s25  ;;  %s3436_s29 = sadd.s32 4294967295, %s3336_s28   ;;  %s3336_s28 = sphi %s3421_s28, %s5420_s28   ;;  %s3332_s27 = sphi %s3419_s27, %s5422_s27   ;;  %s3328_s26 = sphi %s3417_s26, %s5424_s26   ;;  %s3324_s25 = sphi %s3415_s25, %s5423_s25  }
   0x6   : > { %5301 = sst [smem:[#allocation12_spill]] %s3332_s27  ;;  %s2717_s30 = sadd.s32 4294967294, %s3336_s28  }
   0x7   : > { %s3440_s14 = sadd.s32 1, %s3336_s28   ;;  %s313_s15 = sadd.s32 1, %s3332_s27 }
   0x8   : > { %5302 = sst [smem:[#allocation13_spill]] %s3440_s14  ;;  %s310_s16 = ssub.s32 %s3336_s28, %s3440_s14 }
   0x9   : > { %p323_p0 = scmp.ne.s32.totalorder %s3332_s27, %s3328_s26  ;;  %p311_p1 = scmp.eq.s32.totalorder %s310_s16, 0 }
   0xa   : > { %p324_p2 = scmp.eq.s32.totalorder %s3436_s29, 1  ;;  %p329_p3 = scmp.ne.s32.totalorder %s3328_s26, %s3324_s25 }
   0xb   : > { %p330_p4 = scmp.eq.s32.totalorder %s2717_s30, 1  ;;  %p2718_p7 = scmp.ge.s32.totalorder %s3336_s28, 1 }
   0xc   : > { %s3451_s17 = scalar_select %p311_p1, %s3332_s27, %s313_s15  }
   0xd   : > { %p3453_p5 = por %p324_p2, %p323_p0  ;;  %p3457_p6 = por %p330_p4, %p329_p3 }
   0xe   : > { %5303 = sst [smem:[#allocation14_spill]] %s3451_s17  ;;  %p337_p8 = scmp.lt.s32.totalorder %s3336_s28, 3 }
   0xf   : > { %s5304_s18 = scalar_select %p3453_p5, 1, 0 }
  0x10   : > { %s5305_s19 = scalar_select %p3457_p6, 1, 0 }
  0x11   : > { %p5266_p9 = scmp.eq.s32.totalorder %s3436_s29, 0  ;;  %p3464_p10 = pnand %p2718_p7, %p337_p8 }
  0x12   : > { %5306 = sst [smem:[#allocation15_spill]] %s5305_s19  ;;  %s3338_s21 = smov [#allocation2]  }
  0x13   : > { %s5307_s20 = scalar_select %p3464_p10, 1, 0 }
  0x14   : > { %s377_s22 = sshll.u32 %s3338_s21, 4  ;;  %p3076_p11 = pneg %p3464_p10  ;;  %s378_s22 = int_to_ptr.vmem [resolvable:$true] %s377_s22 }
  0x15   : > { %s3339_s23 = smov [#allocation5]   ;;  %s3210_s17 = scalar_lea.hbm %s5258_s10, 16 }
  0x16   : > { %s391_s24 = sshll.u32 %s3339_s23, 4  ;;  %p3472_p12 = pnand %p5266_p9, %p3076_p11  ;;  %s3476_s24 = int_to_ptr.vmem [resolvable:$true] %s391_s24 }
  0x17   : > { %p3211_p13 = scmp.ne.s32.totalorder %s5258_s10, %s3210_s17  ;;  %p3217_p3 = scmp.lt.u32.totalorder %s3210_s17, %s5258_s10 }
  0x18   : > { %p3212_p0 = pneg %p3472_p12 }
  0x1a   : > { %p3213_p1 = pnand %p3212_p0, %p3211_p13 }
  0x1c   : > { %p3214_p2 = pneg %p3213_p1 }
  0x1e   : > { %p3219_p4 = pnand %p3217_p3, %p3214_p2 }
  0x20   : > { %3222 = shalt.err (!%p3219_p4)
}
  0x21   : > { %s3223_s19 = scalar_lea.vmem %s378_s22, 16  ;;  %s3230_s27 = scalar_lea.vmem %s378_s22, 32 }
  0x22   : > { %p3224_p7 = scmp.ne.s32.totalorder %s378_s22, %s3223_s19  ;;  %p3231_p9 = scmp.lt.s32.totalorder %s378_s22, %s378_s22 }
  0x23   : > { %p3232_p6 = scmp.lt.s32.totalorder %s3230_s27, %s3223_s19 }
  0x24   : > { %p3226_p8 = pnand %p3224_p7, %p3212_p0 }
  0x25   : > { %p3233_p5 = por %p3232_p6, %p3231_p9 }
  0x26   : > { %p3227_p11 = pneg %p3226_p8 }
  0x28   : > { %p3234_p10 = pnand %p3233_p5, %p3227_p11 }
  0x2a   : > { %3237 = shalt.err (!%p3234_p10)
}
  0x2b   : > { %3079 = dma.hbm_to_vmem [thread:$0]  (!%p3472_p12), %s5258_s10, 16, %s378_s22, [#allocation3]  }
  0x2c   : > { %s3238_s21 = scalar_lea.hbm %s5260_s12, 16 }
  0x2d   : > { %p3239_p13 = scmp.ne.s32.totalorder %s5260_s12, %s3238_s21  ;;  %p3245_p9 = scmp.lt.u32.totalorder %s3238_s21, %s5260_s12 }
  0x2f   : > { %p3241_p6 = pnand %p3239_p13, %p3212_p0 }
  0x31   : > { %p3242_p5 = pneg %p3241_p6 }
  0x33   : > { %p3247_p10 = pnand %p3245_p9, %p3242_p5 }
  0x35   : > { %3250 = shalt.err (!%p3247_p10)
}
  0x36   : > { %s3251_s22 = scalar_lea.vmem %s3476_s24, 16  ;;  %s3258_s25 = scalar_lea.vmem %s3476_s24, 32 }
  0x37   : > { %p3252_p1 = scmp.ne.s32.totalorder %s3476_s24, %s3251_s22  ;;  %p3259_p4 = scmp.lt.s32.totalorder %s3476_s24, %s3476_s24 }
  0x38   : > { %p3260_p7 = scmp.lt.s32.totalorder %s3258_s25, %s3251_s22 }
  0x39   : > { %p3254_p2 = pnand %p3252_p1, %p3212_p0 }
  0x3a   : > { %p3261_p8 = por %p3260_p7, %p3259_p4 }
  0x3b   : > { %p3255_p3 = pneg %p3254_p2 }
  0x3d   : > { %p3262_p11 = pnand %p3261_p8, %p3255_p3 }
  0x3f   : > { %3265 = shalt.err (!%p3262_p11)
}
  0x40   : > { %3082 = dma.hbm_to_vmem [thread:$0]  (!%p3472_p12), %s5260_s12, 16, %s3476_s24, [#allocation6]  }
  0x41   : > { %p5309_p13 = scmp.ne.s32.totalorder %s5307_s20, 0 }
  0x43   : > { %412 = sbr.rel (%p5309_p13) target bundleno = 1563 (0x61b), region = 72 }
  0x4a   : > { %p5310_p0 = scmp.eq.s32.totalorder %s3436_s29, 0 }
  0x4c   : > { %3311 = dma.done.wait (%p5310_p0), [#allocation3], 16   ;;  %p5311_p6 = pmov %p5310_p0 }
  0x4d   : > { %p5312_p5 = pmov %p5310_p0 }
  0x4e   : > { %3313 = vsyncadd (%p5311_p6), [#allocation3], 4294967280 }
  0x4f   : > { %3315 = dma.done.wait (%p5312_p5), [#allocation6], 16   ;;  %p5313_p9 = pmov %p5310_p0 }
  0x50   : > { %p460_p10 = scmp.lt.s32.totalorder %s3436_s29, 1  ;;  %v3130_v0 = vld [vmem:[%s5249_s1] sm:$0xff]   ;;  %v3131_v1 = vld [vmem:[%s5249_s1 + $0x8] sm:$0xff]   ;;  %v3132_v2 = vld [vmem:[%s5249_s1 + $0x10] sm:$0xff]   ;;  %vm778_vm0 = vcmask 1040384   ;;  %vm875_vm1 = vcmask 1046528  }
  0x51   : > { %3317 = vsyncadd (%p5313_p9), [#allocation6], 4294967280  ;;  %2878 = vmatprep.subr.bf16.mxu0 %v3130_v0  ;;  %3050 = vmatprep.subr.bf16.mxu1 %v3130_v0  ;;  %v3133_v3 = vld [vmem:[%s5249_s1 + $0x18] sm:$0xff]   ;;  %v3134_v9 = vld [vmem:[%s5249_s1 + $0x20] sm:$0xff]   ;;  %vm3341_vm2 = vmmov 0   ;;  %vm2221_vm3 = vcmask 261120  }
  0x52   : > { %s461_s30 = scalar_select %p460_p10, %s3436_s29, 1  ;;  %2879 = vmatpush3.bf16.msra.mxu0 %v3130_v0  ;;  %3058 = vmatpush3.bf16.msra.mxu1 %v3130_v0  ;;  %v3135_v11 = vld [vmem:[%s5249_s1 + $0x28] sm:$0xff]   ;;  %v3136_v12 = vld [vmem:[%s5249_s1 + $0x30] sm:$0xff]   ;;  %v3137_v13 = vld [vmem:[%s5249_s1 + $0x38] sm:$0xff]  }
  0x53   : > { %2880 = vmatprep.subr.bf16.mxu0 %v3131_v1  ;;  %3051 = vmatprep.subr.bf16.mxu1 %v3131_v1  ;;  %v3138_v56 = vld [vmem:[%s5253_s5] sm:$0xff]   ;;  %v3139_v57 = vld [vmem:[%s5253_s5 + $0x8] sm:$0xff]   ;;  %v3140_v58 = vld [vmem:[%s5253_s5 + $0x10] sm:$0xff]   ;;  %s457_s15 = sand.u32 1, %s3328_s26   ;;  %s2793_s24 = sshll.u32 %s3436_s29, 12 }
  0x54   : > { %s2792_s21 = sshll.u32 %s461_s30, 8  ;;  %v3141_v59 = vld [vmem:[%s5253_s5 + $0x18] sm:$0xff]   ;;  %v3142_v60 = vld [vmem:[%s5253_s5 + $0x20] sm:$0xff]   ;;  %v3143_v61 = vld [vmem:[%s5253_s5 + $0x28] sm:$0xff]   ;;  %s2725_s14 = sshll.u32 %s457_s15, 8 }
  0x55   : > { %s3550_s25 = scalar_lea.vmem %s5248_s0, %s2792_s21  ;;  %v3144_v62 = vld [vmem:[%s5253_s5 + $0x30] sm:$0xff]   ;;  %v3145_v63 = vld [vmem:[%s5253_s5 + $0x38] sm:$0xff]   ;;  %v3626_v0 = vld [vmem:[%s5250_s2] ss:$0 sm:$0xff]  ;;  %s5104_s30 = scalar_lea.vmem [#allocation7], %s2725_s14 }
  0x56   : > { %2881 = vmatpush3.bf16.msra.mxu0 %v3131_v1  ;;  %3059 = vmatpush3.bf16.msra.mxu1 %v3131_v1  ;;  %v466_v4 = vld [vmem:[%s3550_s25] sm:$0xff]  ;;  %v467_v5 = vld [vmem:[%s3550_s25 + $0x8] sm:$0xff]  ;;  %v468_v14 = vld [vmem:[%s3550_s25 + $0x10] sm:$0xff]  ;;  %s2633_s17 = sshll.u32 %s5104_s30, 4  ;;  %s5197_s29 = scalar_lea.hbm %s5261_s13, %s2793_s24  ;;  %s5199_s17 = int_to_ptr.vmem [resolvable:$true] %s2633_s17 }
  0x57   : > { %2882 = vmatprep.subr.bf16.mxu0 %v3132_v2  ;;  %3052 = vmatprep.subr.bf16.mxu1 %v3132_v2  ;;  %v498_v6 = vpack.c.bf16 %v467_v5, %v466_v4  ;;  %v482_v7 = vld [vmem:[%s3550_s25 + $0x80] sm:$0xff]  ;;  %v483_v8 = vld [vmem:[%s3550_s25 + $0x88] sm:$0xff]  ;;  %v469_v15 = vld [vmem:[%s3550_s25 + $0x18] sm:$0xff]  ;;  %s5207_s21 = scalar_lea.sflag [#allocation4], %s457_s15  ;;  %s3266_s23 = scalar_lea.vmem %s5199_s17, 4096 }
  0x58   : > { %v506_v10 = vpack.c.bf16 %v483_v8, %v482_v7  ;;  %v484_v16 = vld [vmem:[%s3550_s25 + $0x90] sm:$0xff]  ;;  %v485_v17 = vld [vmem:[%s3550_s25 + $0x98] sm:$0xff]  ;;  %v470_v18 = vld [vmem:[%s3550_s25 + $0x20] sm:$0xff]  ;;  %v499_v22 = vpack.c.bf16 %v469_v15, %v468_v14  ;;  %p3267_p12 = scmp.ne.s32.totalorder %s5199_s17, %s3266_s23  ;;  %p5416_p1 = scmp.ne.s32.totalorder %s5304_s18, 0 }
  0x59   : > { %2894 = vmatprep.mubr.bf16.mxu0 %v498_v6  ;;  %v471_v19 = vld [vmem:[%s3550_s25 + $0x28] sm:$0xff]  ;;  %v486_v20 = vld [vmem:[%s3550_s25 + $0xa0] sm:$0xff]  ;;  %v507_v23 = vpack.c.bf16 %v485_v17, %v484_v16  ;;  %v472_v26 = vld [vmem:[%s3550_s25 + $0x30] sm:$0xff]  ;;  %s3342_s19 = smov [#allocation7]  }
  0x5a   : > { %2883 = vmatpush3.bf16.msra.mxu0 %v3132_v2  ;;  %3060 = vmatpush3.bf16.msra.mxu1 %v3132_v2  ;;  %v487_v21 = vld [vmem:[%s3550_s25 + $0xa8] sm:$0xff]  ;;  %v500_v24 = vpack.c.bf16 %v471_v19, %v470_v18  ;;  %v473_v27 = vld [vmem:[%s3550_s25 + $0x38] sm:$0xff]  ;;  %v488_v28 = vld [vmem:[%s3550_s25 + $0xb0] sm:$0xff]  ;;  %p3268_p2 = pnand %p3267_p12, %p5416_p1  ;;  %s3270_s27 = sshll.u32 %s3342_s19, 4  ;;  %s3271_s27 = int_to_ptr.vmem [resolvable:$false] %s3270_s27 }
  0x5b   : > { %2884 = vmatprep.subr.bf16.mxu0 %v3133_v3  ;;  %3053 = vmatprep.subr.bf16.mxu1 %v3133_v3  ;;  %v508_v25 = vpack.c.bf16 %v487_v21, %v486_v20  ;;  %v489_v29 = vld [vmem:[%s3550_s25 + $0xb8] sm:$0xff]  ;;  %v474_v30 = vld [vmem:[%s3550_s25 + $0x40] sm:$0xff]  ;;  %v475_v31 = vld [vmem:[%s3550_s25 + $0x48] sm:$0xff]  ;;  %v501_v34 = vpack.c.bf16 %v473_v27, %v472_v26  ;;  %s3272_s22 = scalar_lea.vmem %s3271_s27, 8192  ;;  %p3273_p4 = scmp.lt.s32.totalorder %s5199_s17, %s3271_s27 }
  0x5c   : > { %2910 = vmatprep.mubr.bf16.mxu1 %v506_v10  ;;  %v490_v32 = vld [vmem:[%s3550_s25 + $0xc0] sm:$0xff]  ;;  %v491_v33 = vld [vmem:[%s3550_s25 + $0xc8] sm:$0xff]  ;;  %v509_v35 = vpack.c.bf16 %v489_v29, %v488_v28  ;;  %v502_v36 = vpack.c.bf16 %v475_v31, %v474_v30  ;;  %v476_v38 = vld [vmem:[%s3550_s25 + $0x50] sm:$0xff]  ;;  %p3269_p3 = pneg %p3268_p2  ;;  %p3274_p7 = scmp.lt.s32.totalorder %s3272_s22, %s3266_s23 }
  0x5d   : > { %v510_v37 = vpack.c.bf16 %v491_v33, %v490_v32  ;;  %v477_v39 = vld [vmem:[%s3550_s25 + $0x58] sm:$0xff]  ;;  %v478_v40 = vld [vmem:[%s3550_s25 + $0x60] sm:$0xff]  ;;  %v492_v41 = vld [vmem:[%s3550_s25 + $0xd0] sm:$0xff] }
  0x5e   : > { %2885 = vmatpush3.bf16.msra.mxu0 %v3133_v3  ;;  %3061 = vmatpush3.bf16.msra.mxu1 %v3133_v3  ;;  %v493_v42 = vld [vmem:[%s3550_s25 + $0xd8] sm:$0xff]  ;;  %v479_v43 = vld [vmem:[%s3550_s25 + $0x68] sm:$0xff]  ;;  %v494_v44 = vld [vmem:[%s3550_s25 + $0xe0] sm:$0xff]  ;;  %v503_v46 = vpack.c.bf16 %v477_v39, %v476_v38  ;;  %p3275_p8 = por %p3274_p7, %p3273_p4 }
  0x5f   : > { %2886 = vmatprep.subr.bf16.mxu0 %v3134_v9  ;;  %3054 = vmatprep.subr.bf16.mxu1 %v3134_v9  ;;  %v495_v45 = vld [vmem:[%s3550_s25 + $0xe8] sm:$0xff]  ;;  %v511_v47 = vpack.c.bf16 %v493_v42, %v492_v41  ;;  %v504_v48 = vpack.c.bf16 %v479_v43, %v478_v40  ;;  %v480_v50 = vld [vmem:[%s3550_s25 + $0x70] sm:$0xff]  ;;  %v481_v51 = vld [vmem:[%s3550_s25 + $0x78] sm:$0xff] }
  0x60   : > { %v512_v49 = vpack.c.bf16 %v495_v45, %v494_v44  ;;  %v496_v52 = vld [vmem:[%s3550_s25 + $0xf0] sm:$0xff]  ;;  %v497_v53 = vld [vmem:[%s3550_s25 + $0xf8] sm:$0xff]  ;;  %v505_v54 = vpack.c.bf16 %v481_v51, %v480_v50  ;;  %v3631_v2 = vld [vmem:[%s5251_s3 + $0x4] ss:$0 sm:$0xff]  ;;  %p3276_p11 = pnand %p3275_p8, %p3269_p3 }
  0x61   : > { %v513_v55 = vpack.c.bf16 %v497_v53, %v496_v52  ;;  %v3639_v6 = vld [vmem:[%s5251_s3 + $0x1] ss:$0 sm:$0xff]  ;;  %v3664_v21 = vld [vmem:[%s5251_s3] ss:$0 sm:$0xff]  ;;  %v3736_v53 = vld [vmem:[%s5251_s3 + $0x7] ss:$0 sm:$0xff] }
  0x62   : > { %2887 = vmatpush3.bf16.msra.mxu0 %v3134_v9  ;;  %3062 = vmatpush3.bf16.msra.mxu1 %v3134_v9 }
  0x63   : > { %2888 = vmatprep.subr.bf16.mxu0 %v3135_v11  ;;  %3055 = vmatprep.subr.bf16.mxu1 %v3135_v11 }
  0x66   : > { %2889 = vmatpush3.bf16.msra.mxu0 %v3135_v11  ;;  %3063 = vmatpush3.bf16.msra.mxu1 %v3135_v11 }
  0x67   : > { %2890 = vmatprep.subr.bf16.mxu0 %v3136_v12  ;;  %3056 = vmatprep.subr.bf16.mxu1 %v3136_v12 }
  0x6a   : > { %2891 = vmatpush3.bf16.msra.mxu0 %v3136_v12  ;;  %3064 = vmatpush3.bf16.msra.mxu1 %v3136_v12 }
  0x6b   : > { %2892 = vmatprep.subr.bf16.mxu0 %v3137_v13  ;;  %3057 = vmatprep.subr.bf16.mxu1 %v3137_v13 }
  0x6e   : > { %2893 = vmatpush3.bf16.msra.mxu0 %v3137_v13  ;;  %3065 = vmatpush3.bf16.msra.mxu1 %v3137_v13 }
  0x6f   : > { %2926 = vmatprep.subr.bf16.mxu1 %v3138_v56 }
  0x71   : > { %2895 = vmatmul.mubr.bf16.vlgmr.msra.gmra.mrb[0].mxu0 %v499_v22  ;;  %2911 = vmatmul.mubr.bf16.vlgmr.msra.gmra.mrb[0].mxu1 %v507_v23  ;;  %v3671_v23 = vld [vmem:[%s5251_s3 + $0x3] ss:$0 sm:$0xff] }
  0x72   : > { %2898 = vmatprep.mubr.bf16.mxu0 %v500_v24  ;;  %2914 = vmatprep.mubr.bf16.mxu1 %v508_v25 }
  0x73   : > { %2927 = vmatpush3.bf16.msra.mxu1 %v3138_v56 }
  0x74   : > { %2928 = vmatprep.subr.bf16.mxu1 %v3139_v57 }
  0x77   : > { %2929 = vmatpush3.bf16.msra.mxu1 %v3139_v57 }
  0x78   : > { %2930 = vmatprep.subr.bf16.mxu1 %v3140_v58 }
  0x79   : > { %2899 = vmatmul.mubr.bf16.gmra.mrb[4].mxu0 %v501_v34  ;;  %2915 = vmatmul.mubr.bf16.gmra.mrb[4].mxu1 %v509_v35 }
  0x7a   : > { %2902 = vmatprep.mubr.bf16.mxu0 %v502_v36  ;;  %2918 = vmatprep.mubr.bf16.mxu1 %v510_v37  ;;  %v3699_v37 = vld [vmem:[%s5251_s3 + $0x2] ss:$0 sm:$0xff] }
  0x7b   : > { %2931 = vmatpush3.bf16.msra.mxu1 %v3140_v58 }
  0x7c   : > { %2932 = vmatprep.subr.bf16.mxu1 %v3141_v59 }
  0x7f   : > { %2933 = vmatpush3.bf16.msra.mxu1 %v3141_v59 }
  0x80   : > { %2934 = vmatprep.subr.bf16.mxu1 %v3142_v60 }
  0x81   : > { %2903 = vmatmul.mubr.bf16.gmra.mrb[8].mxu0 %v503_v46  ;;  %2919 = vmatmul.mubr.bf16.gmra.mrb[8].mxu1 %v511_v47 }
  0x82   : > { %2906 = vmatprep.mubr.bf16.mxu0 %v504_v48  ;;  %2922 = vmatprep.mubr.bf16.mxu1 %v512_v49 }
  0x83   : > { %2935 = vmatpush3.bf16.msra.mxu1 %v3142_v60 }
  0x84   : > { %2936 = vmatprep.subr.bf16.mxu1 %v3143_v61 }
  0x87   : > { %2937 = vmatpush3.bf16.msra.mxu1 %v3143_v61 }
  0x88   : > { %2938 = vmatprep.subr.bf16.mxu1 %v3144_v62 }
  0x89   : > { %2907 = vmatmul.mubr.bf16.gmra.mrb[12].mxu0 %v505_v54  ;;  %2923 = vmatmul.mubr.bf16.gmra.mrb[12].mxu1 %v513_v55 }
  0x8b   : > { %2939 = vmatpush3.bf16.msra.mxu1 %v3144_v62 }
  0x8c   : > { %2940 = vmatprep.subr.bf16.mxu1 %v3145_v63 }
  0x8f   : > { %2941 = vmatpush3.bf16.msra.mxu1 %v3145_v63 }
 0x144   : > { %v2896_v1 = vpop.f32.mrb[0].mxu0  ;;  %v2912_v3 = vpop.f32.mrb[0].mxu1 }
 0x145   : > { %v3634_v4 = vadd.f32 %v2896_v1, %v3626_v0  ;;  %v619_v5 = vpop.f32.mrb[1].mxu0  ;;  %v3642_v7 = vadd.f32 %v2912_v3, %v3626_v0  ;;  %v683_v8 = vpop.f32.mrb[1].mxu1 }
 0x146   : > { %v3645_v9 = vadd.f32 %v3626_v0, %v619_v5  ;;  %v2897_v10 = vpop.f32.mrb[2].mxu0  ;;  %v3648_v11 = vadd.f32 %v3626_v0, %v683_v8  ;;  %v2913_v12 = vpop.f32.mrb[2].mxu1 }
 0x147   : > { %5314 = vst [vmem:[#allocation16_spill] sm:$0xff] %v3642_v7  ;;  %v782_v13 = vrot.slane %v3634_v4, 7  ;;  %v879_v14 = vrot.slane %v3634_v4, 1  ;;  %v3654_v15 = vmul.f32 %v3631_v2, %v3634_v4  ;;  %v3657_v16 = vadd.f32 %v2897_v10, %v3626_v0  ;;  %v622_v17 = vpop.f32.mrb[3].mxu0  ;;  %v686_v18 = vpop.f32.mrb[3].mxu1 }
 0x148   : > { %5315 = vst [vmem:[#allocation17_spill] sm:$0xff] %v3645_v9  ;;  %v779_v19 = vrot.slane %v3645_v9, 7  ;;  %v876_v20 = vrot.slane %v3645_v9, 1  ;;  %v1017_v22 = vmul.f32 %v3639_v6, %v3645_v9  ;;  %v3675_v24 = vmul.f32 %v3631_v2, %v3645_v9 }
 0x149   : > { %v783_v25 = vrot.slane %v3657_v16, 7  ;;  %v3680_v26 = vmul.f32 %v3631_v2, %v3657_v16  ;;  %v3683_v27 = vadd.f32 %v3626_v0, %v622_v17  ;;  %v3708_v41 = vadd.f32 %v2913_v12, %v3626_v0 }
 0x14a   : > { %v859_v29 = vsel %vm778_vm0, 0.0, %v779_v19  ;;  %v3711_v42 = vadd.f32 %v3626_v0, %v686_v18 }
 0x14b   : > { %5316 = vst [vmem:[#allocation18_spill] sm:$0xff] %v3683_v27  ;;  %v979_v33 = vmul.f32 %v3664_v21, %v859_v29  ;;  %v3692_v34 = vmul.f32 %v3671_v23, %v859_v29  ;;  %v780_v35 = vrot.slane %v3683_v27, 7  ;;  %v877_v36 = vrot.slane %v3683_v27, 1  ;;  %5317 = vst [vmem:[#allocation19_spill] sm:$0xff] %v3708_v41 }
 0x14c   : > { %v1018_v38 = vmul.f32 %v3639_v6, %v3683_v27  ;;  %v3705_v39 = vmul.f32 %v3631_v2, %v3683_v27  ;;  %v2900_v40 = vpop.f32.mrb[4].mxu0  ;;  %v2916_v43 = vpop.f32.mrb[4].mxu1 }
 0x14d   : > { %v3713_v44 = vadd.f32 %v1017_v22, %v979_v33  ;;  %v3716_v45 = vsel %vm778_vm0, %v779_v19, %v780_v35  ;;  %v3721_v46 = vsel %vm875_vm1, %v877_v36, 0.0  ;;  %v3724_v47 = vadd.f32 %v2900_v40, %v3626_v0  ;;  %v635_v48 = vpop.f32.mrb[5].mxu0  ;;  %v699_v49 = vpop.f32.mrb[5].mxu1 }
 0x14e   : > { %v980_v50 = vmul.f32 %v3664_v21, %v3716_v45  ;;  %v1086_v51 = vmul.f32 %v3699_v37, %v3721_v46  ;;  %v3731_v52 = vadd.f32 %v3626_v0, %v635_v48  ;;  %v2901_v54 = vpop.f32.mrb[6].mxu0  ;;  %v2917_v56 = vpop.f32.mrb[6].mxu1  ;;  %v3756_v12 = vadd.f32 %v2916_v43, %v3626_v0 }
 0x14f   : > { %v3742_v59 = vadd.f32 %v2901_v54, %v3626_v0  ;;  %v638_v60 = vpop.f32.mrb[7].mxu0  ;;  %v702_v62 = vpop.f32.mrb[7].mxu1  ;;  %v3759_v17 = vadd.f32 %v3626_v0, %v699_v49  ;;  %v3767_v22 = vadd.f32 %v2917_v56, %v3626_v0  ;;  %v1154_v48 = vmul.f32 %v3671_v23, %v3716_v45 }
 0x150   : > { %5318 = vst [vmem:[#allocation20_spill] sm:$0xff] %v3731_v52  ;;  %v1048_v63 = vadd.f32 %v1018_v38, %v980_v50  ;;  %v785_v1 = vrot.slane %v3731_v52, 7  ;;  %v3749_v5 = vmul.f32 %v3736_v53, %v3731_v52  ;;  %v3753_v10 = vadd.f32 %v3626_v0, %v638_v60  ;;  %5320 = vst [vmem:[#allocation22_spill] sm:$0xff] %v3756_v12 }
 0x151   : > { %5321 = vst [vmem:[#allocation23_spill] sm:$0xff] %v3759_v17  ;;  %5322 = vst [vmem:[#allocation24_spill] sm:$0xff] %v3767_v22  ;;  %v3770_v29 = vadd.f32 %v3626_v0, %v702_v62  ;;  %v1225_v32 = vadd.f32 %v3675_v24, %v3692_v34  ;;  %v1226_v24 = vadd.f32 %v3705_v39, %v1154_v48 }
 0x152   : > { %5319 = vst [vmem:[#allocation21_spill] sm:$0xff] %v3753_v10  ;;  %v3761_v18 = vadd.f32 %v1086_v51, %v1048_v63  ;;  %v3764_v19 = vsel %vm778_vm0, 0.0, %v785_v1  ;;  %v786_v33 = vrot.slane %v3753_v10, 7  ;;  %v5270_v35 = vrot.slane %v3753_v10, 1 }
 0x153   : > { %5323 = vst [vmem:[#allocation25_spill] sm:$0xff] %v3770_v29  ;;  %v3776_v38 = vmul.f32 %v3736_v53, %v3753_v10  ;;  %v5330_v17 = vrot.slane %v3753_v10, 1 }
 0x154   : > { %v2904_v43 = vpop.f32.mrb[8].mxu0  ;;  %v2920_v54 = vpop.f32.mrb[8].mxu1  ;;  %v3784_v56 = vsel %vm778_vm0, %v785_v1, %v786_v33  ;;  %v3789_v60 = vsel %vm875_vm1, %v5270_v35, 0.0 }
 0x155   : > { %v3792_v62 = vadd.f32 %v2904_v43, %v3626_v0  ;;  %v651_v63 = vpop.f32.mrb[9].mxu0  ;;  %v715_v40 = vpop.f32.mrb[9].mxu1  ;;  %v3799_v49 = vadd.f32 %v2920_v54, %v3626_v0  ;;  %v3809_v43 = vsel %vm778_vm0, %v782_v13, %v783_v25  ;;  %v880_v25 = vrot.slane %v3657_v16, 1 }
 0x156   : > { %v3796_v50 = vadd.f32 %v3626_v0, %v651_v63  ;;  %v2905_v51 = vpop.f32.mrb[10].mxu0  ;;  %v3802_v1 = vadd.f32 %v3626_v0, %v715_v40  ;;  %v2921_v33 = vpop.f32.mrb[10].mxu1  ;;  %v878_v63 = vsel %vm875_vm1, %v876_v20, %v877_v36  ;;  %v1156_v61 = vmul.f32 %v3671_v23, %v3809_v43  ;;  %v3858_v20 = vld [vmem:[%s5251_s3 + $0x5] ss:$0 sm:$0xff] }
 0x157   : > { %5324 = vst [vmem:[#allocation26_spill] sm:$0xff] %v3799_v49  ;;  %v3814_v30 = vadd.f32 %v2905_v51, %v3626_v0  ;;  %v654_v54 = vpop.f32.mrb[11].mxu0  ;;  %v3817_v28 = vadd.f32 %v2921_v33, %v3626_v0  ;;  %v718_v40 = vpop.f32.mrb[11].mxu1  ;;  %v3866_v51 = vsel %vm875_vm1, %v879_v14, %v880_v25  ;;  %v3869_v57 = vsel %vm875_vm1, %v880_v25, 0.0  ;;  %v3906_v14 = vld [vmem:[%s5251_s3 + $0x8] ss:$0 sm:$0xff] }
 0x158   : > { %5325 = vst [vmem:[#allocation27_spill] sm:$0xff] %v3802_v1  ;;  %v3822_v31 = vadd.f32 %v3626_v0, %v654_v54  ;;  %v3832_v55 = vadd.f32 %v3626_v0, %v718_v40  ;;  %v3837_v54 = vsel %vm778_vm0, 0.0, %v782_v13  ;;  %v1085_v13 = vmul.f32 %v3699_v37, %v878_v63 }
 0x159   : > { %5326 = vst [vmem:[#allocation28_spill] sm:$0xff] %v3817_v28  ;;  %v1155_v40 = vmul.f32 %v3671_v23, %v3837_v54  ;;  %v1228_v9 = vadd.f32 %v3680_v26, %v1156_v61  ;;  %v1265_v48 = vmul.f32 %v3858_v20, %v878_v63  ;;  %v1267_v63 = vmul.f32 %v3858_v20, %v3866_v51 }
 0x15a   : > { %5327 = vst [vmem:[#allocation29_spill] sm:$0xff] %v3832_v55  ;;  %v3876_v35 = vadd.f32 %v1085_v13, %v3713_v44  ;;  %v3889_v44 = vld [vmem:[%s5251_s3 + $0x6] ss:$0 sm:$0xff]  ;;  %v1268_v13 = vmul.f32 %v3858_v20, %v3869_v57  ;;  %v1375_v28 = vmul.f32 %v3736_v53, %v3634_v4  ;;  %v1376_v1 = vmul.f32 %v3736_v53, %v3657_v16 }
 0x15b   : > { %v1297_v25 = vadd.f32 %v1265_v48, %v1225_v32  ;;  %v1337_v26 = vmul.f32 %v3889_v44, %v3837_v54  ;;  %v1443_v55 = vmul.f32 %v3906_v14, %v3866_v51 }
 0x15c   : > { %v2908_v58 = vpop.f32.mrb[12].mxu0  ;;  %v2924_v36 = vpop.f32.mrb[12].mxu1  ;;  %v1300_v48 = vadd.f32 %v1268_v13, %v1228_v9 }
 0x15d   : > { %v3861_v45 = vadd.f32 %v2908_v58, %v3626_v0  ;;  %v667_v33 = vpop.f32.mrb[13].mxu0  ;;  %v731_v34 = vpop.f32.mrb[13].mxu1  ;;  %v1227_v58 = vadd.f32 %v3654_v15, %v1155_v40  ;;  %v1338_v15 = vmul.f32 %v3889_v44, %v3809_v43  ;;  %v1405_v12 = vadd.f32 %v1375_v28, %v1337_v26 }
 0x15e   : > { %v3873_v8 = vadd.f32 %v3626_v0, %v667_v33  ;;  %v2909_v3 = vpop.f32.mrb[14].mxu0  ;;  %v2925_v27 = vpop.f32.mrb[14].mxu1  ;;  %v3929_v9 = vadd.f32 %v2924_v36, %v3626_v0  ;;  %v1339_v28 = vmul.f32 %v3889_v44, %v3764_v19 }
 0x15f   : > { %v3883_v49 = vadd.f32 %v2909_v3, %v3626_v0  ;;  %v670_v39 = vpop.f32.mrb[15].mxu0  ;;  %v734_v33 = vpop.f32.mrb[15].mxu1  ;;  %v1266_v3 = vmul.f32 %v3858_v20, %v3721_v46  ;;  %v1299_v32 = vadd.f32 %v1267_v63, %v1227_v58  ;;  %v1406_v22 = vadd.f32 %v1376_v1, %v1338_v15 }
 0x160   : > { %v3894_v61 = vadd.f32 %v3626_v0, %v670_v39  ;;  %v3911_v39 = vld [vmem:[%s5252_s4] ss:$0 sm:$0xff]  ;;  %5329 = vst [vmem:[#allocation31_spill] sm:$0xff] %v3929_v9  ;;  %v3932_v58 = vadd.f32 %v3626_v0, %v731_v34  ;;  %v3935_v63 = vadd.f32 %v2925_v27, %v3626_v0  ;;  %v3938_v13 = vadd.f32 %v3626_v0, %v734_v33 }
 0x161   : > { %5328 = vst [vmem:[#allocation30_spill] sm:$0xff] %v3883_v49  ;;  %v1298_v40 = vadd.f32 %v1266_v3, %v1226_v24  ;;  %v1444_v24 = vmul.f32 %v3906_v14, %v3869_v57  ;;  %v1510_v3 = vadd.f32 %v3911_v39, %v1297_v25  ;;  %v5331_v25 = vrot.slane %v3731_v52, 1 }
 0x162   : > { %v1473_v1 = vadd.f32 %v1443_v55, %v1405_v12  ;;  %v5287_v34 = vrot.slane %v3929_v9, 7  ;;  %v3953_v0 = vmul.f32 %v3631_v2, %v3929_v9  ;;  %v3957_v33 = vmul.f32 %v3736_v53, %v3929_v9 }
 0x163   : > { %v1511_v46 = vadd.f32 %v3911_v39, %v1298_v40  ;;  %v3945_v40 = vsel %vm875_vm1, %v5331_v25, %v5330_v17  ;;  %v1474_v36 = vadd.f32 %v1444_v24, %v1406_v22  ;;  %v3974_v27 = vmul.f32 %v3631_v2, %v3935_v63 }
 0x164   : > { %5332 = vst [vmem:[#allocation32_spill] sm:$0xff] %v3953_v0  ;;  %5333 = vst [vmem:[#allocation33_spill] sm:$0xff] %v3957_v33  ;;  %v1574_v26 = vadd.f32 %v1510_v3, %v1473_v1  ;;  %v3964_v55 = vsel %vm778_vm0, 0.0, %v5287_v34  ;;  %v1340_v34 = vmul.f32 %v3889_v44, %v3784_v56  ;;  %v1407_v12 = vadd.f32 %v3749_v5, %v1339_v28 }
 0x165   : > { %v1575_v25 = vadd.f32 %v1511_v46, %v1474_v36  ;;  %5334 = vst [vmem:[#allocation34_spill] sm:$0xff] %v3964_v55  ;;  %v3969_v22 = vmul.f32 %v3671_v23, %v3964_v55  ;;  %5336 = vst [vmem:[#allocation36_spill] sm:$0xff] %v3974_v27  ;;  %v3978_v46 = vmul.f32 %v3736_v53, %v3935_v63  ;;  %v5338_v55 = vrot.slane %v3742_v59, 7 }
 0x166   : > { %v1606_v3 = vadd.f32 3.0, %v1574_v26  ;;  %v1445_v24 = vmul.f32 %v3906_v14, %v3945_v40  ;;  %v1446_v15 = vmul.f32 %v3906_v14, %v3789_v60  ;;  %v1512_v17 = vadd.f32 %v3911_v39, %v1299_v32 }
 0x167   : > { %5335 = vst [vmem:[#allocation35_spill] sm:$0xff] %v3969_v22  ;;  %5337 = vst [vmem:[#allocation37_spill] sm:$0xff] %v3978_v46  ;;  %v1607_v1 = vadd.f32 3.0, %v1575_v25  ;;  %v1408_v22 = vadd.f32 %v3776_v38, %v1340_v34  ;;  %v1513_v46 = vadd.f32 %v3911_v39, %v1300_v48  ;;  %v5339_v5 = vrot.slane %v3724_v47, 7 }
 0x168   : > { %v1638_v27 = vmax.f32 %v1606_v3, 0.0  ;;  %v1475_v36 = vadd.f32 %v1445_v24, %v1407_v12  ;;  %v1544_v33 = vadd.f32 %v1512_v17, %v3876_v35  ;;  %v886_v35 = vrot.slane %v3742_v59, 1 }
 0x169   : > { %v1639_v0 = vmax.f32 %v1607_v1, 0.0  ;;  %v3997_v28 = vsel %vm778_vm0, %v5339_v5, %v5338_v55  ;;  %v5340_v9 = vmov %v5339_v5  ;;  %v1476_v38 = vadd.f32 %v1446_v15, %v1408_v22 }
 0x16a   : > { %v4002_v32 = vsel %vm778_vm0, 0.0, %v5340_v9  ;;  %v1670_v3 = vmin.f32 %v1638_v27, 6.0  ;;  %v1545_v48 = vadd.f32 %v1513_v46, %v3761_v18  ;;  %v1576_v34 = vadd.f32 %v1544_v33, %v1475_v36 }
 0x16b   : > { %v1671_v1 = vmin.f32 %v1639_v0, 6.0  ;;  %v981_v17 = vmul.f32 %v3664_v21, %v3837_v54  ;;  %v982_v55 = vmul.f32 %v3664_v21, %v3809_v43  ;;  %v1019_v9 = vmul.f32 %v3639_v6, %v3634_v4 }
 0x16c   : > { %v1702_v12 = vmul.f32 %v1670_v3, %v1574_v26  ;;  %v1577_v5 = vadd.f32 %v1545_v48, %v1476_v38  ;;  %v1608_v27 = vadd.f32 3.0, %v1576_v34  ;;  %v5341_v0 = vrot.slane %v3724_v47, 1 }
 0x16d   : > { %v1703_v24 = vmul.f32 %v1671_v1, %v1575_v25  ;;  %v4018_v33 = vsel %vm875_vm1, %v886_v35, 0.0  ;;  %v1020_v54 = vmul.f32 %v3639_v6, %v3657_v16  ;;  %v1049_v25 = vadd.f32 %v1019_v9, %v981_v17 }
 0x16e   : > { %v4015_v18 = vsel %vm875_vm1, %v5341_v0, %v886_v35  ;;  %v1734_v15 = vmul.f32 0.16666667, %v1702_v12  ;;  %v1609_v26 = vadd.f32 3.0, %v1577_v5  ;;  %v1640_v22 = vmax.f32 %v1608_v27, 0.0 }
 0x16f   : > { %v1735_v43 = vmul.f32 0.16666667, %v1703_v24  ;;  %v1050_v46 = vadd.f32 %v1020_v54, %v982_v55  ;;  %v1087_v36 = vmul.f32 %v3699_v37, %v3866_v51  ;;  %v1088_v3 = vmul.f32 %v3699_v37, %v3869_v57 }
 0x170   : > { %v1641_v38 = vmax.f32 %v1609_v26, 0.0  ;;  %v1157_v48 = vmul.f32 %v3671_v23, %v3764_v19  ;;  %v1158_v35 = vmul.f32 %v3671_v23, %v3784_v56  ;;  %v1672_v12 = vmin.f32 %v1640_v22, 6.0 }
 0x171   : > { %v1766_v1 = vpack.c.bf16 %v1735_v43, %v1734_v15  ;;  %v1117_v24 = vadd.f32 %v1087_v36, %v1049_v25  ;;  %v1118_v0 = vadd.f32 %v1088_v3, %v1050_v46  ;;  %v1197_v17 = vmul.f32 %v3631_v2, %v3731_v52 }
 0x172   : > { %v1673_v55 = vmin.f32 %v1641_v38, 6.0  ;;  %v1198_v51 = vmul.f32 %v3631_v2, %v3753_v10  ;;  %v1269_v57 = vmul.f32 %v3858_v20, %v3945_v40  ;;  %v1270_v9 = vmul.f32 %v3858_v20, %v3789_v60 }
 0x173   : > { %2942 = vmatprep.mubr.bf16.mxu1 %v1766_v1  ;;  %v1704_v27 = vmul.f32 %v1672_v12, %v1576_v34  ;;  %v1229_v54 = vadd.f32 %v1197_v17, %v1157_v48  ;;  %v1341_v15 = vmul.f32 %v3889_v44, %v4002_v32  ;;  %v1342_v43 = vmul.f32 %v3889_v44, %v3997_v28 }
 0x174   : > { %v1705_v26 = vmul.f32 %v1673_v55, %v1577_v5  ;;  %v1230_v25 = vadd.f32 %v1198_v51, %v1158_v35  ;;  %v1379_v22 = vmul.f32 %v3736_v53, %v3724_v47  ;;  %v1380_v46 = vmul.f32 %v3736_v53, %v3742_v59 }
 0x175   : > { %v1736_v36 = vmul.f32 0.16666667, %v1704_v27  ;;  %v1301_v3 = vadd.f32 %v1269_v57, %v1229_v54  ;;  %v1447_v34 = vmul.f32 %v3906_v14, %v4015_v18  ;;  %v1448_v1 = vmul.f32 %v3906_v14, %v4018_v33 }
 0x176   : > { %v1737_v38 = vmul.f32 0.16666667, %v1705_v26  ;;  %v1302_v48 = vadd.f32 %v1270_v9, %v1230_v25  ;;  %v1409_v12 = vadd.f32 %v1379_v22, %v1341_v15  ;;  %v1410_v17 = vadd.f32 %v1380_v46, %v1342_v43 }
 0x177   : > { %v1514_v5 = vadd.f32 %v3911_v39, %v1301_v3  ;;  %v5342_v35 = vrot.slane %v3822_v31, 7  ;;  %v5343_v55 = vrot.slane %v3796_v50, 7  ;;  %v889_v54 = vrot.slane %v3822_v31, 1 }
 0x178   : > { %v1767_v26 = vpack.c.bf16 %v1737_v38, %v1736_v36  ;;  %v1477_v9 = vadd.f32 %v1447_v34, %v1409_v12  ;;  %v1478_v15 = vadd.f32 %v1448_v1, %v1410_v17  ;;  %v1515_v43 = vadd.f32 %v3911_v39, %v1302_v48 }
 0x179   : > { %v4056_v51 = vsel %vm778_vm0, %v5343_v55, %v5342_v35  ;;  %v5344_v57 = vmov %v5343_v55  ;;  %v1546_v25 = vadd.f32 %v1514_v5, %v1117_v24  ;;  %v5345_v22 = vrot.slane %v3796_v50, 1 }
 0x17a   : > { %v4061_v27 = vsel %vm778_vm0, 0.0, %v5344_v57  ;;  %v4071_v3 = vsel %vm875_vm1, %v889_v54, 0.0  ;;  %v983_v35 = vmul.f32 %v3664_v21, %v3764_v19  ;;  %2943 = vmatmul.mubr.bf16.vlgmr.msra.gmra.mrb[16].mxu1 %v1767_v26  ;;  %v1547_v55 = vadd.f32 %v1515_v43, %v1118_v0 }
 0x17b   : > { %v4068_v46 = vsel %vm875_vm1, %v5345_v22, %v889_v54  ;;  %v984_v36 = vmul.f32 %v3664_v21, %v3784_v56  ;;  %v1021_v34 = vmul.f32 %v3639_v6, %v3731_v52  ;;  %v1022_v24 = vmul.f32 %v3639_v6, %v3753_v10 }
 0x17c   : > { %v1578_v1 = vadd.f32 %v1546_v25, %v1477_v9  ;;  %v1089_v38 = vmul.f32 %v3699_v37, %v3945_v40  ;;  %v1090_v48 = vmul.f32 %v3699_v37, %v3789_v60  ;;  %v1159_v19 = vmul.f32 %v3671_v23, %v4002_v32 }
 0x17d   : > { %v1579_v0 = vadd.f32 %v1547_v55, %v1478_v15  ;;  %v1051_v12 = vadd.f32 %v1021_v34, %v983_v35  ;;  %v1052_v17 = vadd.f32 %v1022_v24, %v984_v36  ;;  %v1160_v56 = vmul.f32 %v3671_v23, %v3997_v28 }
 0x17e   : > { %v1610_v5 = vadd.f32 3.0, %v1578_v1  ;;  %v1199_v57 = vmul.f32 %v3631_v2, %v3724_v47  ;;  %v1200_v54 = vmul.f32 %v3631_v2, %v3742_v59  ;;  %v1271_v40 = vmul.f32 %v3858_v20, %v4015_v18 }
 0x17f   : > { %v1611_v60 = vadd.f32 3.0, %v1579_v0  ;;  %v1119_v26 = vadd.f32 %v1089_v38, %v1051_v12  ;;  %v1120_v9 = vadd.f32 %v1090_v48, %v1052_v17  ;;  %v1272_v15 = vmul.f32 %v3858_v20, %v4018_v33 }
 0x180   : > { %v1642_v43 = vmax.f32 %v1610_v5, 0.0  ;;  %v1231_v25 = vadd.f32 %v1199_v57, %v1159_v19  ;;  %v1232_v22 = vadd.f32 %v1200_v54, %v1160_v56  ;;  %v1343_v35 = vmul.f32 %v3889_v44, %v4061_v27 }
 0x181   : > { %v1643_v55 = vmax.f32 %v1611_v60, 0.0  ;;  %v1344_v36 = vmul.f32 %v3889_v44, %v4056_v51  ;;  %v1381_v34 = vmul.f32 %v3736_v53, %v3796_v50  ;;  %v1382_v24 = vmul.f32 %v3736_v53, %v3822_v31 }
 0x182   : > { %v1674_v38 = vmin.f32 %v1642_v43, 6.0  ;;  %v1303_v48 = vadd.f32 %v1271_v40, %v1231_v25  ;;  %v1304_v12 = vadd.f32 %v1272_v15, %v1232_v22  ;;  %v1449_v19 = vmul.f32 %v3906_v14, %v4068_v46 }
 0x183   : > { %v1675_v17 = vmin.f32 %v1643_v55, 6.0  ;;  %v1411_v56 = vadd.f32 %v1381_v34, %v1343_v35  ;;  %v1412_v5 = vadd.f32 %v1382_v24, %v1344_v36  ;;  %v1450_v57 = vmul.f32 %v3906_v14, %v4071_v3 }
 0x184   : > { %v1706_v54 = vmul.f32 %v1674_v38, %v1578_v1  ;;  %v1516_v60 = vadd.f32 %v3911_v39, %v1303_v48  ;;  %v1517_v10 = vadd.f32 %v3911_v39, %v1304_v12  ;;  %v5346_v52 = vrot.slane %v3814_v30, 7 }
 0x185   : > { %v5347_v43 = vrot.slane %v3792_v62, 7  ;;  %v1707_v15 = vmul.f32 %v1675_v17, %v1579_v0  ;;  %v1479_v25 = vadd.f32 %v1449_v19, %v1411_v56  ;;  %v1480_v22 = vadd.f32 %v1450_v57, %v1412_v5 }
 0x186   : > { %v1738_v1 = vmul.f32 0.16666667, %v1706_v54  ;;  %v1548_v36 = vadd.f32 %v1516_v60, %v1119_v26  ;;  %v1549_v34 = vadd.f32 %v1517_v10, %v1120_v9  ;;  %v892_v24 = vrot.slane %v3814_v30, 1 }
 0x187   : > { %v4116_v40 = vsel %vm778_vm0, %v5347_v43, %v5346_v52  ;;  %v5348_v35 = vmov %v5347_v43  ;;  %v1739_v38 = vmul.f32 0.16666667, %v1707_v15  ;;  %v985_v48 = vmul.f32 %v3664_v21, %v4002_v32 }
 0x188   : > { %v4121_v55 = vsel %vm778_vm0, 0.0, %v5348_v35  ;;  %v986_v52 = vmul.f32 %v3664_v21, %v3997_v28  ;;  %v1023_v0 = vmul.f32 %v3639_v6, %v3724_v47  ;;  %v1580_v12 = vadd.f32 %v1548_v36, %v1479_v25 }
 0x189   : > { %v1581_v19 = vadd.f32 %v1549_v34, %v1480_v22  ;;  %v5349_v17 = vrot.slane %v3792_v62, 1  ;;  %v4136_v10 = vsel %vm875_vm1, %v892_v24, 0.0  ;;  %v1768_v26 = vpack.c.bf16 %v1739_v38, %v1738_v1 }
 0x18a   : > { %v1024_v32 = vmul.f32 %v3639_v6, %v3742_v59  ;;  %v1053_v9 = vadd.f32 %v1023_v0, %v985_v48  ;;  %v1091_v28 = vmul.f32 %v3699_v37, %v4015_v18  ;;  %v1612_v5 = vadd.f32 3.0, %v1580_v12 }
 0x18b   : > { %v4133_v56 = vsel %vm875_vm1, %v5349_v17, %v892_v24  ;;  %v1613_v57 = vadd.f32 3.0, %v1581_v19  ;;  %v1092_v54 = vmul.f32 %v3699_v37, %v4018_v33  ;;  %v1161_v60 = vmul.f32 %v3671_v23, %v4061_v27  ;;  %2946 = vmatprep.mubr.bf16.mxu1 %v1768_v26 }
 0x18c   : > { %v1054_v43 = vadd.f32 %v1024_v32, %v986_v52  ;;  %v1121_v15 = vadd.f32 %v1091_v28, %v1053_v9  ;;  %v1162_v25 = vmul.f32 %v3671_v23, %v4056_v51  ;;  %v1201_v22 = vmul.f32 %v3631_v2, %v3796_v50 }
 0x18d   : > { %v1644_v35 = vmax.f32 %v1612_v5, 0.0  ;;  %v1645_v1 = vmax.f32 %v1613_v57, 0.0  ;;  %v1202_v18 = vmul.f32 %v3631_v2, %v3822_v31  ;;  %v1273_v33 = vmul.f32 %v3858_v20, %v4068_v46 }
 0x18e   : > { %v1122_v36 = vadd.f32 %v1092_v54, %v1054_v43  ;;  %v1233_v34 = vadd.f32 %v1201_v22, %v1161_v60  ;;  %v1274_v24 = vmul.f32 %v3858_v20, %v4071_v3  ;;  %v1345_v38 = vmul.f32 %v3889_v44, %v4121_v55 }
 0x18f   : > { %v1676_v48 = vmin.f32 %v1644_v35, 6.0  ;;  %v1677_v52 = vmin.f32 %v1645_v1, 6.0  ;;  %v1234_v0 = vadd.f32 %v1202_v18, %v1162_v25  ;;  %v1346_v17 = vmul.f32 %v3889_v44, %v4116_v40 }
 0x190   : > { %v1305_v26 = vadd.f32 %v1273_v33, %v1233_v34  ;;  %v1383_v32 = vmul.f32 %v3736_v53, %v3792_v62  ;;  %v1384_v9 = vmul.f32 %v3736_v53, %v3814_v30  ;;  %v1451_v28 = vmul.f32 %v3906_v14, %v4133_v56 }
 0x191   : > { %v1708_v5 = vmul.f32 %v1676_v48, %v1580_v12  ;;  %v1709_v57 = vmul.f32 %v1677_v52, %v1581_v19  ;;  %v1306_v54 = vadd.f32 %v1274_v24, %v1234_v0  ;;  %v1452_v60 = vmul.f32 %v3906_v14, %v4136_v10 }
 0x192   : > { %v1413_v43 = vadd.f32 %v1383_v32, %v1345_v38  ;;  %v1414_v25 = vadd.f32 %v1384_v9, %v1346_v17  ;;  %v1518_v22 = vadd.f32 %v3911_v39, %v1305_v26  ;;  %v5350_v35 = vrot.slane %v3894_v61, 7 }
 0x193   : > { %v5351_v1 = vrot.slane %v3873_v8, 7  ;;  %v1740_v33 = vmul.f32 0.16666667, %v1708_v5  ;;  %v1741_v34 = vmul.f32 0.16666667, %v1709_v57  ;;  %v1519_v12 = vadd.f32 %v3911_v39, %v1306_v54 }
 0x194   : > { %v1481_v38 = vadd.f32 %v1451_v28, %v1413_v43  ;;  %v1482_v48 = vadd.f32 %v1452_v60, %v1414_v25  ;;  %v1550_v52 = vadd.f32 %v1518_v22, %v1121_v15  ;;  %v895_v0 = vrot.slane %v3894_v61, 1 }
 0x195   : > { %v4174_v18 = vsel %vm778_vm0, %v5351_v1, %v5350_v35  ;;  %v5352_v19 = vmov %v5351_v1  ;;  %v1769_v17 = vpack.c.bf16 %v1741_v34, %v1740_v33  ;;  %v1551_v26 = vadd.f32 %v1519_v12, %v1122_v36 }
 0x196   : > { %v4180_v24 = vsel %vm778_vm0, 0.0, %v5352_v19  ;;  %v987_v32 = vmul.f32 %v3664_v21, %v4061_v27  ;;  %v988_v9 = vmul.f32 %v3664_v21, %v4056_v51  ;;  %v1582_v5 = vadd.f32 %v1550_v52, %v1481_v38 }
 0x197   : > { %v5353_v57 = vrot.slane %v3873_v8, 1  ;;  %v4193_v28 = vsel %vm875_vm1, %v895_v0, 0.0  ;;  %v1025_v15 = vmul.f32 %v3639_v6, %v3796_v50  ;;  %2947 = vmatmul.mubr.bf16.gmra.mrb[20].mxu1 %v1769_v17  ;;  %v1583_v36 = vadd.f32 %v1551_v26, %v1482_v48 }
 0x198   : > { %v1026_v27 = vmul.f32 %v3639_v6, %v3822_v31  ;;  %v1093_v51 = vmul.f32 %v3699_v37, %v4068_v46  ;;  %v1094_v60 = vmul.f32 %v3699_v37, %v4071_v3  ;;  %v1614_v43 = vadd.f32 3.0, %v1582_v5 }
 0x199   : > { %v4190_v54 = vsel %vm875_vm1, %v5353_v57, %v895_v0  ;;  %v1055_v25 = vadd.f32 %v1025_v15, %v987_v32  ;;  %v1163_v22 = vmul.f32 %v3671_v23, %v4121_v55  ;;  %v1164_v35 = vmul.f32 %v3671_v23, %v4116_v40 }
 0x19a   : > { %v1615_v1 = vadd.f32 3.0, %v1583_v36  ;;  %v1056_v33 = vadd.f32 %v1026_v27, %v988_v9  ;;  %v1203_v34 = vmul.f32 %v3631_v2, %v3792_v62  ;;  %v1204_v12 = vmul.f32 %v3631_v2, %v3814_v30 }
 0x19b   : > { %v1646_v46 = vmax.f32 %v1614_v43, 0.0  ;;  %v1123_v19 = vadd.f32 %v1093_v51, %v1055_v25  ;;  %v1275_v3 = vmul.f32 %v3858_v20, %v4133_v56  ;;  %v1276_v38 = vmul.f32 %v3858_v20, %v4136_v10 }
 0x19c   : > { %v1647_v48 = vmax.f32 %v1615_v1, 0.0  ;;  %v1124_v52 = vadd.f32 %v1094_v60, %v1056_v33  ;;  %v1235_v0 = vadd.f32 %v1203_v34, %v1163_v22  ;;  %v1236_v17 = vadd.f32 %v1204_v12, %v1164_v35 }
 0x19d   : > { %v1678_v26 = vmin.f32 %v1646_v46, 6.0  ;;  %v1347_v32 = vmul.f32 %v3889_v44, %v4180_v24  ;;  %v1348_v9 = vmul.f32 %v3889_v44, %v4174_v18  ;;  %v1385_v57 = vmul.f32 %v3736_v53, %v3873_v8 }
 0x19e   : > { %v1679_v15 = vmin.f32 %v1647_v48, 6.0  ;;  %v1307_v27 = vadd.f32 %v1275_v3, %v1235_v0  ;;  %v1308_v51 = vadd.f32 %v1276_v38, %v1236_v17  ;;  %v1386_v43 = vmul.f32 %v3736_v53, %v3894_v61 }
 0x19f   : > { %v1710_v25 = vmul.f32 %v1678_v26, %v1582_v5  ;;  %v1415_v60 = vadd.f32 %v1385_v57, %v1347_v32  ;;  %v1453_v22 = vmul.f32 %v3906_v14, %v4190_v54  ;;  %v1454_v35 = vmul.f32 %v3906_v14, %v4193_v28 }
 0x1a0   : > { %v1711_v1 = vmul.f32 %v1679_v15, %v1583_v36  ;;  %v1416_v33 = vadd.f32 %v1386_v43, %v1348_v9  ;;  %v1520_v34 = vadd.f32 %v3911_v39, %v1307_v27  ;;  %v1521_v12 = vadd.f32 %v3911_v39, %v1308_v51 }
 0x1a1   : > { %v1742_v46 = vmul.f32 0.16666667, %v1710_v25  ;;  %v1483_v3 = vadd.f32 %v1453_v22, %v1415_v60  ;;  %v5354_v38 = vrot.slane %v3883_v49, 7  ;;  %v5355_v48 = vrot.slane %v3861_v45, 7 }
 0x1a2   : > { %v1743_v36 = vmul.f32 0.16666667, %v1711_v1  ;;  %v1484_v26 = vadd.f32 %v1454_v35, %v1416_v33  ;;  %v1552_v32 = vadd.f32 %v1520_v34, %v1123_v19  ;;  %v1553_v9 = vadd.f32 %v1521_v12, %v1124_v52 }
 0x1a3   : > { %v4234_v5 = vsel %vm778_vm0, %v5355_v48, %v5354_v38  ;;  %v5356_v0 = vmov %v5355_v48  ;;  %v898_v57 = vrot.slane %v3883_v49, 1  ;;  %v989_v15 = vmul.f32 %v3664_v21, %v4121_v55 }
 0x1a4   : > { %v4239_v17 = vsel %vm778_vm0, 0.0, %v5356_v0  ;;  %v990_v27 = vmul.f32 %v3664_v21, %v4116_v40  ;;  %v1027_v51 = vmul.f32 %v3639_v6, %v3792_v62  ;;  %v1770_v43 = vpack.c.bf16 %v1743_v36, %v1742_v46 }
 0x1a5   : > { %v1584_v25 = vadd.f32 %v1552_v32, %v1483_v3  ;;  %v1585_v60 = vadd.f32 %v1553_v9, %v1484_v26  ;;  %v1028_v22 = vmul.f32 %v3639_v6, %v3814_v30  ;;  %v5357_v19 = vrot.slane %v3861_v45, 1 }
 0x1a6   : > { %v4256_v35 = vsel %vm875_vm1, %v898_v57, 0.0  ;;  %v1057_v55 = vadd.f32 %v1027_v51, %v989_v15  ;;  %v1095_v40 = vmul.f32 %v3699_v37, %v4133_v56  ;;  %2950 = vmatprep.mubr.bf16.mxu1 %v1770_v43  ;;  %v1096_v12 = vmul.f32 %v3699_v37, %v4136_v10 }
 0x1a7   : > { %v4253_v52 = vsel %vm875_vm1, %v5357_v19, %v898_v57  ;;  %v1616_v1 = vadd.f32 3.0, %v1584_v25  ;;  %v1617_v33 = vadd.f32 3.0, %v1585_v60  ;;  %v1058_v34 = vadd.f32 %v1028_v22, %v990_v27 }
 0x1a8   : > { %v1125_v46 = vadd.f32 %v1095_v40, %v1057_v55  ;;  %v1165_v3 = vmul.f32 %v3671_v23, %v4180_v24  ;;  %v1166_v38 = vmul.f32 %v3671_v23, %v4174_v18  ;;  %v1205_v48 = vmul.f32 %v3631_v2, %v3873_v8 }
 0x1a9   : > { %v1648_v0 = vmax.f32 %v1616_v1, 0.0  ;;  %v1649_v36 = vmax.f32 %v1617_v33, 0.0  ;;  %v1126_v56 = vadd.f32 %v1096_v12, %v1058_v34  ;;  %v1206_v26 = vmul.f32 %v3631_v2, %v3894_v61 }
 0x1aa   : > { %v1237_v32 = vadd.f32 %v1205_v48, %v1165_v3  ;;  %v1277_v10 = vmul.f32 %v3858_v20, %v4190_v54  ;;  %v1278_v9 = vmul.f32 %v3858_v20, %v4193_v28  ;;  %v1349_v57 = vmul.f32 %v3889_v44, %v4239_v17 }
 0x1ab   : > { %v1680_v15 = vmin.f32 %v1648_v0, 6.0  ;;  %v1681_v27 = vmin.f32 %v1649_v36, 6.0  ;;  %v1238_v51 = vadd.f32 %v1206_v26, %v1166_v38  ;;  %v1350_v43 = vmul.f32 %v3889_v44, %v4234_v5 }
 0x1ac   : > { %v1309_v22 = vadd.f32 %v1277_v10, %v1237_v32  ;;  %v1387_v19 = vmul.f32 %v3736_v53, %v3861_v45  ;;  %v1388_v55 = vmul.f32 %v3736_v53, %v3883_v49  ;;  %v1455_v40 = vmul.f32 %v3906_v14, %v4253_v52 }
 0x1ad   : > { %v1712_v1 = vmul.f32 %v1680_v15, %v1584_v25  ;;  %v1713_v33 = vmul.f32 %v1681_v27, %v1585_v60  ;;  %v1310_v34 = vadd.f32 %v1278_v9, %v1238_v51  ;;  %v1456_v12 = vmul.f32 %v3906_v14, %v4256_v35 }
 0x1ae   : > { %v1417_v3 = vadd.f32 %v1387_v19, %v1349_v57  ;;  %v1418_v38 = vadd.f32 %v1388_v55, %v1350_v43  ;;  %v1522_v48 = vadd.f32 %v3911_v39, %v1309_v22  ;;  %v5358_v0 = vrot.slane %v3711_v42, 7 }
 0x1af   : > { %v5359_v36 = vrot.slane %v3648_v11, 7  ;;  %v1744_v32 = vmul.f32 0.16666667, %v1712_v1  ;;  %v1745_v10 = vmul.f32 0.16666667, %v1713_v33  ;;  %v1523_v25 = vadd.f32 %v3911_v39, %v1310_v34 }
 0x1b0   : > { %v1485_v57 = vadd.f32 %v1455_v40, %v1417_v3  ;;  %v1486_v15 = vadd.f32 %v1456_v12, %v1418_v38  ;;  %v1554_v27 = vadd.f32 %v1522_v48, %v1125_v46  ;;  %v901_v51 = vrot.slane %v3711_v42, 1 }
 0x1b1   : > { %v4292_v26 = vsel %vm778_vm0, %v5359_v36, %v5358_v0  ;;  %v5360_v60 = vmov %v5359_v36  ;;  %v1771_v43 = vpack.c.bf16 %v1745_v10, %v1744_v32  ;;  %v1555_v22 = vadd.f32 %v1523_v25, %v1126_v56 }
 0x1b2   : > { %v4298_v9 = vsel %vm778_vm0, 0.0, %v5360_v60  ;;  %v991_v19 = vmul.f32 %v3664_v21, %v4180_v24  ;;  %v992_v55 = vmul.f32 %v3664_v21, %v4174_v18  ;;  %v1586_v1 = vadd.f32 %v1554_v27, %v1485_v57 }
 0x1b3   : > { %v5361_v33 = vrot.slane %v3648_v11, 1  ;;  %v4311_v40 = vsel %vm875_vm1, %v901_v51, 0.0  ;;  %v1029_v46 = vmul.f32 %v3639_v6, %v3873_v8  ;;  %2951 = vmatmul.mubr.bf16.gmra.mrb[24].mxu1 %v1771_v43  ;;  %v1587_v56 = vadd.f32 %v1555_v22, %v1486_v15 }
 0x1b4   : > { %v1030_v24 = vmul.f32 %v3639_v6, %v3894_v61  ;;  %v1097_v21 = vmul.f32 %v3699_v37, %v4190_v54  ;;  %v1098_v18 = vmul.f32 %v3699_v37, %v4193_v28  ;;  %v1618_v12 = vadd.f32 3.0, %v1586_v1 }
 0x1b5   : > { %v4308_v34 = vsel %vm875_vm1, %v5361_v33, %v901_v51  ;;  %v1059_v3 = vadd.f32 %v1029_v46, %v991_v19  ;;  %v1167_v38 = vmul.f32 %v3671_v23, %v4239_v17  ;;  %v1168_v48 = vmul.f32 %v3671_v23, %v4234_v5 }
 0x1b6   : > { %v1619_v0 = vadd.f32 3.0, %v1587_v56  ;;  %v1060_v36 = vadd.f32 %v1030_v24, %v992_v55  ;;  %v1207_v32 = vmul.f32 %v3631_v2, %v3861_v45  ;;  %v1208_v6 = vmul.f32 %v3631_v2, %v3883_v49 }
 0x1b7   : > { %v1650_v54 = vmax.f32 %v1618_v12, 0.0  ;;  %v1127_v10 = vadd.f32 %v1097_v21, %v1059_v3  ;;  %v1279_v28 = vmul.f32 %v3858_v20, %v4253_v52  ;;  %v1280_v25 = vmul.f32 %v3858_v20, %v4256_v35 }
 0x1b8   : > { %v1651_v60 = vmax.f32 %v1619_v0, 0.0  ;;  %v1128_v57 = vadd.f32 %v1098_v18, %v1060_v36  ;;  %v1239_v15 = vadd.f32 %v1207_v32, %v1167_v38  ;;  %v1240_v23 = vadd.f32 %v1208_v6, %v1168_v48 }
 0x1b9   : > { %v1682_v27 = vmin.f32 %v1650_v54, 6.0  ;;  %v1351_v51 = vmul.f32 %v3889_v44, %v4298_v9  ;;  %v1352_v43 = vmul.f32 %v3889_v44, %v4292_v26  ;;  %v1389_v2 = vmul.f32 %v3736_v53, %v3648_v11 }
 0x1ba   : > { %v1683_v22 = vmin.f32 %v1651_v60, 6.0  ;;  %v1311_v19 = vadd.f32 %v1279_v28, %v1239_v15  ;;  %v1312_v55 = vadd.f32 %v1280_v25, %v1240_v23  ;;  %v1390_v33 = vmul.f32 %v3736_v53, %v3711_v42  ;;  %v4363_v23 = vld [vmem:[%s5251_s3] ss:$0 sm:$0xff] }
 0x1bb   : > { %v1714_v46 = vmul.f32 %v1682_v27, %v1586_v1  ;;  %v1419_v24 = vadd.f32 %v1389_v2, %v1351_v51  ;;  %v1457_v21 = vmul.f32 %v3906_v14, %v4308_v34  ;;  %v1458_v18 = vmul.f32 %v3906_v14, %v4311_v40 }
 0x1bc   : > { %v1715_v12 = vmul.f32 %v1683_v22, %v1587_v56  ;;  %v1420_v3 = vadd.f32 %v1390_v33, %v1352_v43  ;;  %v1524_v38 = vadd.f32 %v3911_v39, %v1311_v19  ;;  %v1525_v48 = vadd.f32 %v3911_v39, %v1312_v55  ;;  %v4372_v43 = vld [vmem:[%s5251_s3 + $0x1] ss:$0 sm:$0xff] }
 0x1bd   : > { %v1746_v0 = vmul.f32 0.16666667, %v1714_v46  ;;  %v1487_v36 = vadd.f32 %v1457_v21, %v1419_v24  ;;  %v5362_v32 = vrot.slane %v3708_v41, 7  ;;  %v5363_v53 = vrot.slane %v3642_v7, 7 }
 0x1be   : > { %v1747_v56 = vmul.f32 0.16666667, %v1715_v12  ;;  %v1488_v28 = vadd.f32 %v1458_v18, %v1420_v3  ;;  %v1556_v25 = vadd.f32 %v1524_v38, %v1127_v10  ;;  %v1557_v60 = vadd.f32 %v1525_v48, %v1128_v57  ;;  %v4391_v12 = vld [vmem:[%s5251_s3 + $0x2] ss:$0 sm:$0xff]  ;;  %v4398_v48 = vld [vmem:[%s5251_s3 + $0x3] ss:$0 sm:$0xff] }
 0x1bf   : > { %v4352_v1 = vsel %vm778_vm0, %v5363_v53, %v5362_v32  ;;  %v5364_v6 = vmov %v5363_v53  ;;  %v904_v15 = vrot.slane %v3708_v41, 1  ;;  %v993_v27 = vmul.f32 %v4363_v23, %v4239_v17 }
 0x1c0   : > { %v4357_v54 = vsel %vm778_vm0, 0.0, %v5364_v6  ;;  %v994_v51 = vmul.f32 %v4363_v23, %v4234_v5  ;;  %v1031_v10 = vmul.f32 %v4372_v43, %v3861_v45  ;;  %v1772_v57 = vpack.c.bf16 %v1747_v56, %v1746_v0  ;;  %v4407_v0 = vld [vmem:[%s5251_s3 + $0x4] ss:$0 sm:$0xff] }
 0x1c1   : > { %v1588_v2 = vadd.f32 %v1556_v25, %v1487_v36  ;;  %v1589_v22 = vadd.f32 %v1557_v60, %v1488_v28  ;;  %v1032_v19 = vmul.f32 %v4372_v43, %v3883_v49  ;;  %v5365_v55 = vrot.slane %v3642_v7, 1 }
 0x1c2   : > { %v4384_v5 = vsel %vm875_vm1, %v904_v15, 0.0  ;;  %v1061_v33 = vadd.f32 %v1031_v10, %v993_v27  ;;  %v1099_v46 = vmul.f32 %v3699_v37, %v4253_v52  ;;  %2954 = vmatprep.mubr.bf16.mxu1 %v1772_v57  ;;  %v1100_v3 = vmul.f32 %v4391_v12, %v4256_v35 }
 0x1c3   : > { %v4381_v17 = vsel %vm875_vm1, %v5365_v55, %v904_v15  ;;  %v1620_v24 = vadd.f32 3.0, %v1588_v2  ;;  %v1621_v21 = vadd.f32 3.0, %v1589_v22  ;;  %v1062_v18 = vadd.f32 %v1032_v19, %v994_v51  ;;  %v4424_v19 = vld [vmem:[%s5251_s3 + $0x7] ss:$0 sm:$0xff] }
 0x1c4   : > { %v1129_v38 = vadd.f32 %v1099_v46, %v1061_v33  ;;  %v1169_v37 = vmul.f32 %v4398_v48, %v4298_v9  ;;  %v1170_v52 = vmul.f32 %v4398_v48, %v4292_v26  ;;  %v1209_v35 = vmul.f32 %v4407_v0, %v3648_v11 }
 0x1c5   : > { %v1652_v36 = vmax.f32 %v1620_v24, 0.0  ;;  %v1653_v32 = vmax.f32 %v1621_v21, 0.0  ;;  %v1130_v53 = vadd.f32 %v1100_v3, %v1062_v18  ;;  %v1210_v6 = vmul.f32 %v4407_v0, %v3711_v42 }
 0x1c6   : > { %v1241_v56 = vadd.f32 %v1209_v35, %v1169_v37  ;;  %v1281_v28 = vmul.f32 %v3858_v20, %v4308_v34  ;;  %v1282_v25 = vmul.f32 %v3858_v20, %v4311_v40  ;;  %v1353_v60 = vmul.f32 %v3889_v44, %v4357_v54 }
 0x1c7   : > { %v1684_v15 = vmin.f32 %v1652_v36, 6.0  ;;  %v1685_v27 = vmin.f32 %v1653_v32, 6.0  ;;  %v1242_v51 = vadd.f32 %v1210_v6, %v1170_v52  ;;  %v1354_v10 = vmul.f32 %v3889_v44, %v4352_v1  ;;  %v5367_v32 = vld [vmem:[#allocation23_spill] sm:$0xff] }
 0x1c8   : > { %v1313_v57 = vadd.f32 %v1281_v28, %v1241_v56  ;;  %v1391_v55 = vmul.f32 %v4424_v19, %v3642_v7  ;;  %v1392_v33 = vmul.f32 %v4424_v19, %v3708_v41  ;;  %v1459_v46 = vmul.f32 %v3906_v14, %v4381_v17 }
 0x1c9   : > { %v1716_v24 = vmul.f32 %v1684_v15, %v1588_v2  ;;  %v1717_v21 = vmul.f32 %v1685_v27, %v1589_v22  ;;  %v1314_v18 = vadd.f32 %v1282_v25, %v1242_v51  ;;  %v1460_v3 = vmul.f32 %v3906_v14, %v4384_v5 }
 0x1ca   : > { %v1421_v37 = vadd.f32 %v1391_v55, %v1353_v60  ;;  %v1422_v52 = vadd.f32 %v1392_v33, %v1354_v10  ;;  %v1526_v35 = vadd.f32 %v3911_v39, %v1313_v57  ;;  %v5366_v36 = vrot.slane %v3770_v29, 7 }
 0x1cb   : > { %v5368_v6 = vrot.slane %v5367_v32, 7  ;;  %v1748_v28 = vmul.f32 0.16666667, %v1716_v24  ;;  %v1749_v49 = vmul.f32 0.16666667, %v1717_v21  ;;  %v1527_v2 = vadd.f32 %v3911_v39, %v1314_v18 }
 0x1cc   : > { %v1489_v60 = vadd.f32 %v1459_v46, %v1421_v37  ;;  %v1490_v15 = vadd.f32 %v1460_v3, %v1422_v52  ;;  %v1558_v27 = vadd.f32 %v1526_v35, %v1129_v38  ;;  %v907_v51 = vrot.slane %v3770_v29, 1 }
 0x1cd   : > { %v4440_v56 = vsel %vm778_vm0, %v5368_v6, %v5366_v36  ;;  %v5369_v22 = vmov %v5368_v6  ;;  %v1773_v10 = vpack.c.bf16 %v1749_v49, %v1748_v28  ;;  %v1559_v57 = vadd.f32 %v1527_v2, %v1130_v53 }
 0x1ce   : > { %v4446_v25 = vsel %vm778_vm0, 0.0, %v5369_v22  ;;  %v995_v55 = vmul.f32 %v4363_v23, %v4298_v9  ;;  %v996_v33 = vmul.f32 %v4363_v23, %v4292_v26  ;;  %v1590_v24 = vadd.f32 %v1558_v27, %v1489_v60 }
 0x1cf   : > { %v5370_v21 = vrot.slane %v5367_v32, 1  ;;  %v4459_v46 = vsel %vm875_vm1, %v907_v51, 0.0  ;;  %v1033_v38 = vmul.f32 %v4372_v43, %v3648_v11  ;;  %2955 = vmatmul.mubr.bf16.gmra.mrb[28].mxu1 %v1773_v10  ;;  %v1591_v49 = vadd.f32 %v1559_v57, %v1490_v15 }
 0x1d0   : > { %v1034_v9 = vmul.f32 %v4372_v43, %v3711_v42  ;;  %v1101_v26 = vmul.f32 %v4391_v12, %v4308_v34  ;;  %v1102_v53 = vmul.f32 %v4391_v12, %v4311_v40  ;;  %v1622_v3 = vadd.f32 3.0, %v1590_v24 }
 0x1d1   : > { %v4456_v18 = vsel %vm875_vm1, %v5370_v21, %v907_v51  ;;  %v1063_v37 = vadd.f32 %v1033_v38, %v995_v55  ;;  %v1171_v52 = vmul.f32 %v4398_v48, %v4357_v54  ;;  %v1172_v35 = vmul.f32 %v4398_v48, %v4352_v1 }
 0x1d2   : > { %v1623_v36 = vadd.f32 3.0, %v1591_v49  ;;  %v1064_v6 = vadd.f32 %v1034_v9, %v996_v33  ;;  %v1211_v28 = vmul.f32 %v4407_v0, %v3642_v7  ;;  %v1212_v2 = vmul.f32 %v4407_v0, %v3708_v41 }
 0x1d3   : > { %v1654_v34 = vmax.f32 %v1622_v3, 0.0  ;;  %v1131_v22 = vadd.f32 %v1101_v26, %v1063_v37  ;;  %v1283_v40 = vmul.f32 %v3858_v20, %v4381_v17  ;;  %v1284_v60 = vmul.f32 %v3858_v20, %v4384_v5 }
 0x1d4   : > { %v1655_v15 = vmax.f32 %v1623_v36, 0.0  ;;  %v1132_v27 = vadd.f32 %v1102_v53, %v1064_v6  ;;  %v1243_v51 = vadd.f32 %v1211_v28, %v1171_v52  ;;  %v1244_v10 = vadd.f32 %v1212_v2, %v1172_v35 }
 0x1d5   : > { %v1686_v57 = vmin.f32 %v1654_v34, 6.0  ;;  %v1355_v55 = vmul.f32 %v3889_v44, %v4446_v25  ;;  %v1356_v33 = vmul.f32 %v3889_v44, %v4440_v56  ;;  %v1393_v21 = vmul.f32 %v4424_v19, %v5367_v32  ;;  %v5371_v34 = vld [vmem:[#allocation24_spill] sm:$0xff] }
 0x1d6   : > { %v1687_v38 = vmin.f32 %v1655_v15, 6.0  ;;  %v1315_v9 = vadd.f32 %v1283_v40, %v1243_v51  ;;  %v1316_v26 = vadd.f32 %v1284_v60, %v1244_v10  ;;  %v1394_v20 = vmul.f32 %v4424_v19, %v3770_v29  ;;  %v5373_v60 = vld [vmem:[#allocation22_spill] sm:$0xff] }
 0x1d7   : > { %v1718_v3 = vmul.f32 %v1686_v57, %v1590_v24  ;;  %v1423_v53 = vadd.f32 %v1393_v21, %v1355_v55  ;;  %v1461_v37 = vmul.f32 %v3906_v14, %v4456_v18  ;;  %v1462_v52 = vmul.f32 %v3906_v14, %v4459_v46 }
 0x1d8   : > { %v1719_v35 = vmul.f32 %v1687_v38, %v1591_v49  ;;  %v1424_v36 = vadd.f32 %v1394_v20, %v1356_v33  ;;  %v1528_v44 = vadd.f32 %v3911_v39, %v1315_v9  ;;  %v1529_v6 = vadd.f32 %v3911_v39, %v1316_v26 }
 0x1d9   : > { %v1750_v28 = vmul.f32 0.16666667, %v1718_v3  ;;  %v1491_v2 = vadd.f32 %v1461_v37, %v1423_v53  ;;  %v5372_v40 = vrot.slane %v5371_v34, 7  ;;  %v5374_v15 = vrot.slane %v5373_v60, 7 }
 0x1da   : > { %v1751_v14 = vmul.f32 0.16666667, %v1719_v35  ;;  %v1492_v49 = vadd.f32 %v1462_v52, %v1424_v36  ;;  %v1560_v57 = vadd.f32 %v1528_v44, %v1131_v22  ;;  %v1561_v55 = vadd.f32 %v1529_v6, %v1132_v27 }
 0x1db   : > { %v4500_v24 = vsel %vm778_vm0, %v5374_v15, %v5372_v40  ;;  %v5375_v51 = vmov %v5374_v15  ;;  %v910_v39 = vrot.slane %v5371_v34, 1  ;;  %v997_v33 = vmul.f32 %v4363_v23, %v4357_v54 }
 0x1dc   : > { %v4505_v10 = vsel %vm778_vm0, 0.0, %v5375_v51  ;;  %v998_v21 = vmul.f32 %v4363_v23, %v4352_v1  ;;  %v1035_v38 = vmul.f32 %v4372_v43, %v3642_v7  ;;  %v1774_v9 = vpack.c.bf16 %v1751_v14, %v1750_v28 }
 0x1dd   : > { %v1592_v26 = vadd.f32 %v1560_v57, %v1491_v2  ;;  %v1593_v20 = vadd.f32 %v1561_v55, %v1492_v49  ;;  %v1036_v3 = vmul.f32 %v4372_v43, %v3708_v41  ;;  %v5376_v22 = vrot.slane %v5373_v60, 1  ;;  %v4548_v55 = vld [vmem:[%s5251_s3 + $0x6] ss:$0 sm:$0xff] }
 0x1de   : > { %v4522_v53 = vsel %vm875_vm1, %v910_v39, 0.0  ;;  %v1065_v54 = vadd.f32 %v1035_v38, %v997_v33  ;;  %v1103_v1 = vmul.f32 %v4391_v12, %v4381_v17  ;;  %2958 = vmatprep.mubr.bf16.mxu1 %v1774_v9  ;;  %v1104_v36 = vmul.f32 %v4391_v12, %v4384_v5  ;;  %v4539_v5 = vld [vmem:[%s5251_s3 + $0x5] ss:$0 sm:$0xff] }
 0x1df   : > { %v4519_v27 = vsel %vm875_vm1, %v5376_v22, %v910_v39  ;;  %v1624_v37 = vadd.f32 3.0, %v1592_v26  ;;  %v1625_v52 = vadd.f32 3.0, %v1593_v20  ;;  %v1066_v35 = vadd.f32 %v1036_v3, %v998_v21 }
 0x1e0   : > { %v1133_v44 = vadd.f32 %v1103_v1, %v1065_v54  ;;  %v1173_v6 = vmul.f32 %v4398_v48, %v4446_v25  ;;  %v1174_v28 = vmul.f32 %v4398_v48, %v4440_v56  ;;  %v1213_v2 = vmul.f32 %v4407_v0, %v5367_v32  ;;  %v4561_v1 = vld [vmem:[%s5251_s3 + $0x8] ss:$0 sm:$0xff] }
 0x1e1   : > { %v1656_v40 = vmax.f32 %v1624_v37, 0.0  ;;  %v1657_v15 = vmax.f32 %v1625_v52, 0.0  ;;  %v1134_v17 = vadd.f32 %v1104_v36, %v1066_v35  ;;  %v1214_v51 = vmul.f32 %v4407_v0, %v3770_v29 }
 0x1e2   : > { %v1245_v14 = vadd.f32 %v1213_v2, %v1173_v6  ;;  %v1285_v49 = vmul.f32 %v4539_v5, %v4456_v18  ;;  %v1286_v57 = vmul.f32 %v4539_v5, %v4459_v46  ;;  %v1357_v39 = vmul.f32 %v4548_v55, %v4505_v10 }
 0x1e3   : > { %v1688_v33 = vmin.f32 %v1656_v40, 6.0  ;;  %v1689_v21 = vmin.f32 %v1657_v15, 6.0  ;;  %v1246_v38 = vadd.f32 %v1214_v51, %v1174_v28  ;;  %v1358_v9 = vmul.f32 %v4548_v55, %v4500_v24  ;;  %v4570_v40 = vld [vmem:[%s5252_s4] ss:$0 sm:$0xff]  ;;  %v5377_v51 = vld [vmem:[#allocation29_spill] sm:$0xff] }
 0x1e4   : > { %v1317_v3 = vadd.f32 %v1285_v49, %v1245_v14  ;;  %v1395_v22 = vmul.f32 %v4424_v19, %v5373_v60  ;;  %v1396_v54 = vmul.f32 %v4424_v19, %v5371_v34  ;;  %v1463_v37 = vmul.f32 %v4561_v1, %v4519_v27  ;;  %v5379_v49 = vld [vmem:[#allocation27_spill] sm:$0xff] }
 0x1e5   : > { %v1720_v52 = vmul.f32 %v1688_v33, %v1592_v26  ;;  %v1721_v35 = vmul.f32 %v1689_v21, %v1593_v20  ;;  %v1318_v36 = vadd.f32 %v1286_v57, %v1246_v38  ;;  %v1464_v6 = vmul.f32 %v4561_v1, %v4522_v53 }
 0x1e6   : > { %v1425_v28 = vadd.f32 %v1395_v22, %v1357_v39  ;;  %v1426_v2 = vadd.f32 %v1396_v54, %v1358_v9  ;;  %v1530_v15 = vadd.f32 %v4570_v40, %v1317_v3  ;;  %v5378_v14 = vrot.slane %v5377_v51, 7 }
 0x1e7   : > { %v5380_v41 = vrot.slane %v5379_v49, 7  ;;  %v1752_v20 = vmul.f32 0.16666667, %v1720_v52  ;;  %v1753_v57 = vmul.f32 0.16666667, %v1721_v35  ;;  %v1531_v33 = vadd.f32 %v4570_v40, %v1318_v36 }
 0x1e8   : > { %v1493_v38 = vadd.f32 %v1463_v37, %v1425_v28  ;;  %v1494_v9 = vadd.f32 %v1464_v6, %v1426_v2  ;;  %v1562_v22 = vadd.f32 %v1530_v15, %v1133_v44  ;;  %v913_v3 = vrot.slane %v5377_v51, 1 }
 0x1e9   : > { %v4578_v26 = vsel %vm778_vm0, %v5380_v41, %v5378_v14  ;;  %v5381_v39 = vmov %v5380_v41  ;;  %v1775_v54 = vpack.c.bf16 %v1753_v57, %v1752_v20  ;;  %v1563_v7 = vadd.f32 %v1531_v33, %v1134_v17 }
 0x1ea   : > { %v4584_v21 = vsel %vm778_vm0, 0.0, %v5381_v39  ;;  %v999_v41 = vmul.f32 %v4363_v23, %v4446_v25  ;;  %v1000_v52 = vmul.f32 %v4363_v23, %v4440_v56  ;;  %v1594_v35 = vadd.f32 %v1562_v22, %v1493_v38 }
 0x1eb   : > { %v5382_v36 = vrot.slane %v5379_v49, 1  ;;  %v4597_v37 = vsel %vm875_vm1, %v913_v3, 0.0  ;;  %v1037_v44 = vmul.f32 %v4372_v43, %v5367_v32  ;;  %2959 = vmatmul.mubr.bf16.gmra.mrb[32].mxu1 %v1775_v54  ;;  %v1595_v17 = vadd.f32 %v1563_v7, %v1494_v9 }
 0x1ec   : > { %v1038_v25 = vmul.f32 %v4372_v43, %v3770_v29  ;;  %v1105_v56 = vmul.f32 %v4391_v12, %v4456_v18  ;;  %v1106_v6 = vmul.f32 %v4391_v12, %v4459_v46  ;;  %v1626_v28 = vadd.f32 3.0, %v1594_v35 }
 0x1ed   : > { %v4594_v14 = vsel %vm875_vm1, %v5382_v36, %v913_v3  ;;  %v1067_v2 = vadd.f32 %v1037_v44, %v999_v41  ;;  %v1175_v15 = vmul.f32 %v4398_v48, %v4505_v10  ;;  %v1176_v20 = vmul.f32 %v4398_v48, %v4500_v24 }
 0x1ee   : > { %v1627_v57 = vadd.f32 3.0, %v1595_v17  ;;  %v1068_v33 = vadd.f32 %v1038_v25, %v1000_v52  ;;  %v1215_v7 = vmul.f32 %v4407_v0, %v5373_v60  ;;  %v1216_v39 = vmul.f32 %v4407_v0, %v5371_v34 }
 0x1ef   : > { %v1658_v18 = vmax.f32 %v1626_v28, 0.0  ;;  %v1135_v38 = vadd.f32 %v1105_v56, %v1067_v2  ;;  %v1287_v46 = vmul.f32 %v4539_v5, %v4519_v27  ;;  %v1288_v9 = vmul.f32 %v4539_v5, %v4522_v53 }
 0x1f0   : > { %v1659_v22 = vmax.f32 %v1627_v57, 0.0  ;;  %v1136_v3 = vadd.f32 %v1106_v6, %v1068_v33  ;;  %v1247_v54 = vadd.f32 %v1215_v7, %v1175_v15  ;;  %v1248_v41 = vadd.f32 %v1216_v39, %v1176_v20 }
 0x1f1   : > { %v1690_v36 = vmin.f32 %v1658_v18, 6.0  ;;  %v1359_v52 = vmul.f32 %v4548_v55, %v4584_v21  ;;  %v1360_v44 = vmul.f32 %v4548_v55, %v4578_v26  ;;  %v1397_v25 = vmul.f32 %v4424_v19, %v5379_v49 }
 0x1f2   : > { %v1691_v56 = vmin.f32 %v1659_v22, 6.0  ;;  %v1319_v28 = vadd.f32 %v1287_v46, %v1247_v54  ;;  %v1320_v2 = vadd.f32 %v1288_v9, %v1248_v41  ;;  %v1398_v29 = vmul.f32 %v4424_v19, %v5377_v51  ;;  %v5383_v9 = vld [vmem:[#allocation28_spill] sm:$0xff]  ;;  %v5385_v41 = vld [vmem:[#allocation26_spill] sm:$0xff] }
 0x1f3   : > { %v1722_v57 = vmul.f32 %v1690_v36, %v1594_v35  ;;  %v1427_v6 = vadd.f32 %v1397_v25, %v1359_v52  ;;  %v1465_v15 = vmul.f32 %v4561_v1, %v4594_v14  ;;  %v1466_v20 = vmul.f32 %v4561_v1, %v4597_v37 }
 0x1f4   : > { %v1723_v33 = vmul.f32 %v1691_v56, %v1595_v17  ;;  %v1428_v7 = vadd.f32 %v1398_v29, %v1360_v44  ;;  %v1532_v39 = vadd.f32 %v4570_v40, %v1319_v28  ;;  %v1533_v18 = vadd.f32 %v4570_v40, %v1320_v2 }
 0x1f5   : > { %v1754_v22 = vmul.f32 0.16666667, %v1722_v57  ;;  %v1495_v46 = vadd.f32 %v1465_v15, %v1427_v6  ;;  %v5384_v54 = vrot.slane %v5383_v9, 7  ;;  %v5386_v32 = vrot.slane %v5385_v41, 7 }
 0x1f6   : > { %v1755_v17 = vmul.f32 0.16666667, %v1723_v33  ;;  %v1496_v29 = vadd.f32 %v1466_v20, %v1428_v7  ;;  %v1564_v44 = vadd.f32 %v1532_v39, %v1135_v38  ;;  %v1565_v25 = vadd.f32 %v1533_v18, %v1136_v3 }
 0x1f7   : > { %v4638_v35 = vsel %vm778_vm0, %v5386_v32, %v5384_v54  ;;  %v5387_v36 = vmov %v5386_v32  ;;  %v916_v56 = vrot.slane %v5383_v9, 1  ;;  %v1001_v28 = vmul.f32 %v4363_v23, %v4505_v10 }
 0x1f8   : > { %v4643_v52 = vsel %vm778_vm0, 0.0, %v5387_v36  ;;  %v1002_v2 = vmul.f32 %v4363_v23, %v4500_v24  ;;  %v1039_v32 = vmul.f32 %v4372_v43, %v5373_v60  ;;  %v1776_v57 = vpack.c.bf16 %v1755_v17, %v1754_v22 }
 0x1f9   : > { %v1596_v6 = vadd.f32 %v1564_v44, %v1495_v46  ;;  %v1597_v15 = vadd.f32 %v1565_v25, %v1496_v29  ;;  %v1040_v33 = vmul.f32 %v4372_v43, %v5371_v34  ;;  %v5388_v38 = vrot.slane %v5385_v41, 1 }
 0x1fa   : > { %v4660_v20 = vsel %vm875_vm1, %v916_v56, 0.0  ;;  %v1069_v10 = vadd.f32 %v1039_v32, %v1001_v28  ;;  %v1107_v24 = vmul.f32 %v4391_v12, %v4519_v27  ;;  %2962 = vmatprep.mubr.bf16.mxu1 %v1776_v57  ;;  %v1108_v22 = vmul.f32 %v4391_v12, %v4522_v53 }
 0x1fb   : > { %v4657_v3 = vsel %vm875_vm1, %v5388_v38, %v916_v56  ;;  %v1628_v7 = vadd.f32 3.0, %v1596_v6  ;;  %v1629_v39 = vadd.f32 3.0, %v1597_v15  ;;  %v1070_v18 = vadd.f32 %v1040_v33, %v1002_v2 }
 0x1fc   : > { %v1137_v46 = vadd.f32 %v1107_v24, %v1069_v10  ;;  %v1177_v54 = vmul.f32 %v4398_v48, %v4584_v21  ;;  %v1178_v36 = vmul.f32 %v4398_v48, %v4578_v26  ;;  %v1217_v17 = vmul.f32 %v4407_v0, %v5379_v49 }
 0x1fd   : > { %v1660_v29 = vmax.f32 %v1628_v7, 0.0  ;;  %v1661_v44 = vmax.f32 %v1629_v39, 0.0  ;;  %v1138_v27 = vadd.f32 %v1108_v22, %v1070_v18  ;;  %v1218_v25 = vmul.f32 %v4407_v0, %v5377_v51 }
 0x1fe   : > { %v1249_v56 = vadd.f32 %v1217_v17, %v1177_v54  ;;  %v1289_v53 = vmul.f32 %v4539_v5, %v4594_v14  ;;  %v1290_v28 = vmul.f32 %v4539_v5, %v4597_v37  ;;  %v1361_v2 = vmul.f32 %v4548_v55, %v4643_v52 }
 0x1ff   : > { %v1692_v32 = vmin.f32 %v1660_v29, 6.0  ;;  %v1693_v57 = vmin.f32 %v1661_v44, 6.0  ;;  %v1250_v33 = vadd.f32 %v1218_v25, %v1178_v36  ;;  %v1362_v38 = vmul.f32 %v4548_v55, %v4638_v35 }
 0x200   : > { %v1321_v10 = vadd.f32 %v1289_v53, %v1249_v56  ;;  %v1399_v24 = vmul.f32 %v4424_v19, %v5385_v41  ;;  %v1400_v7 = vmul.f32 %v4424_v19, %v5383_v9  ;;  %v1467_v39 = vmul.f32 %v4561_v1, %v4657_v3 }
 0x201   : > { %v1724_v18 = vmul.f32 %v1692_v32, %v1596_v6  ;;  %v1725_v22 = vmul.f32 %v1693_v57, %v1597_v15  ;;  %v1322_v54 = vadd.f32 %v1290_v28, %v1250_v33  ;;  %v1468_v17 = vmul.f32 %v4561_v1, %v4660_v20 }
 0x202   : > { %v1429_v36 = vadd.f32 %v1399_v24, %v1361_v2  ;;  %v1430_v29 = vadd.f32 %v1400_v7, %v1362_v38  ;;  %v1534_v44 = vadd.f32 %v4570_v40, %v1321_v10  ;;  %v5389_v25 = vrot.slane %v3938_v13, 7 }
 0x203   : > { %v5390_v56 = vrot.slane %v3932_v58, 7  ;;  %v1756_v34 = vmul.f32 0.16666667, %v1724_v18  ;;  %v1757_v60 = vmul.f32 0.16666667, %v1725_v22  ;;  %v1535_v6 = vadd.f32 %v4570_v40, %v1322_v54 }
 0x204   : > { %v1497_v2 = vadd.f32 %v1467_v39, %v1429_v36  ;;  %v1498_v32 = vadd.f32 %v1468_v17, %v1430_v29  ;;  %v1566_v57 = vadd.f32 %v1534_v44, %v1137_v46  ;;  %v919_v33 = vrot.slane %v3938_v13, 1 }
 0x205   : > { %v4696_v53 = vsel %vm778_vm0, %v5390_v56, %v5389_v25  ;;  %v5391_v15 = vmov %v5390_v56  ;;  %v1777_v38 = vpack.c.bf16 %v1757_v60, %v1756_v34  ;;  %v1567_v10 = vadd.f32 %v1535_v6, %v1138_v27 }
 0x206   : > { %v4702_v28 = vsel %vm778_vm0, 0.0, %v5391_v15  ;;  %v1003_v24 = vmul.f32 %v4363_v23, %v4584_v21  ;;  %v1004_v7 = vmul.f32 %v4363_v23, %v4578_v26  ;;  %v1598_v18 = vadd.f32 %v1566_v57, %v1497_v2 }
 0x207   : > { %v5392_v22 = vrot.slane %v3932_v58, 1  ;;  %v4715_v39 = vsel %vm875_vm1, %v919_v33, 0.0  ;;  %v1041_v46 = vmul.f32 %v4372_v43, %v5379_v49  ;;  %2963 = vmatmul.mubr.bf16.gmra.mrb[36].mxu1 %v1777_v38  ;;  %v1599_v34 = vadd.f32 %v1567_v10, %v1498_v32 }
 0x208   : > { %v1042_v60 = vmul.f32 %v4372_v43, %v5377_v51  ;;  %v1109_v26 = vmul.f32 %v4391_v12, %v4594_v14  ;;  %v1110_v21 = vmul.f32 %v4391_v12, %v4597_v37  ;;  %v1630_v27 = vadd.f32 3.0, %v1598_v18 }
 0x209   : > { %v4712_v54 = vsel %vm875_vm1, %v5392_v22, %v919_v33  ;;  %v1071_v17 = vadd.f32 %v1041_v46, %v1003_v24  ;;  %v1179_v36 = vmul.f32 %v4398_v48, %v4643_v52  ;;  %v1180_v29 = vmul.f32 %v4398_v48, %v4638_v35 }
 0x20a   : > { %v1631_v44 = vadd.f32 3.0, %v1599_v34  ;;  %v1072_v25 = vadd.f32 %v1042_v60, %v1004_v7  ;;  %v1219_v56 = vmul.f32 %v4407_v0, %v5385_v41  ;;  %v1220_v6 = vmul.f32 %v4407_v0, %v5383_v9 }
 0x20b   : > { %v1662_v14 = vmax.f32 %v1630_v27, 0.0  ;;  %v1139_v15 = vadd.f32 %v1109_v26, %v1071_v17  ;;  %v1291_v37 = vmul.f32 %v4539_v5, %v4657_v3  ;;  %v1292_v2 = vmul.f32 %v4539_v5, %v4660_v20 }
 0x20c   : > { %v1663_v32 = vmax.f32 %v1631_v44, 0.0  ;;  %v1140_v57 = vadd.f32 %v1110_v21, %v1072_v25  ;;  %v1251_v33 = vadd.f32 %v1219_v56, %v1179_v36  ;;  %v1252_v38 = vadd.f32 %v1220_v6, %v1180_v29 }
 0x20d   : > { %v1694_v10 = vmin.f32 %v1662_v14, 6.0  ;;  %v1363_v24 = vmul.f32 %v4548_v55, %v4702_v28  ;;  %v1364_v7 = vmul.f32 %v4548_v55, %v4696_v53  ;;  %v1401_v22 = vmul.f32 %v4424_v19, %v3932_v58 }
 0x20e   : > { %v1695_v46 = vmin.f32 %v1663_v32, 6.0  ;;  %v1323_v60 = vadd.f32 %v1291_v37, %v1251_v33  ;;  %v1324_v26 = vadd.f32 %v1292_v2, %v1252_v38  ;;  %v1402_v27 = vmul.f32 %v4424_v19, %v3938_v13  ;;  %v5394_v32 = vld [vmem:[#allocation31_spill] sm:$0xff] }
 0x20f   : > { %v1726_v17 = vmul.f32 %v1694_v10, %v1598_v18  ;;  %v1431_v21 = vadd.f32 %v1401_v22, %v1363_v24  ;;  %v1469_v36 = vmul.f32 %v4561_v1, %v4712_v54  ;;  %v1470_v29 = vmul.f32 %v4561_v1, %v4715_v39 }
 0x210   : > { %v1727_v44 = vmul.f32 %v1695_v46, %v1599_v34  ;;  %v1432_v25 = vadd.f32 %v1402_v27, %v1364_v7  ;;  %v1536_v56 = vadd.f32 %v4570_v40, %v1323_v60  ;;  %v1537_v6 = vadd.f32 %v4570_v40, %v1324_v26 }
 0x211   : > { %v1758_v14 = vmul.f32 0.16666667, %v1726_v17  ;;  %v1499_v37 = vadd.f32 %v1469_v36, %v1431_v21  ;;  %v5393_v2 = vrot.slane %v3935_v63, 7  ;;  %v5395_v19 = vrot.slane %v5394_v32, 7 }
 0x212   : > { %v5396_v33 = vrot.slane %v3935_v63, 1  ;;  %v5397_v38 = vrot.slane %v5394_v32, 1  ;;  %v1759_v34 = vmul.f32 0.16666667, %v1727_v44  ;;  %v1500_v24 = vadd.f32 %v1470_v29, %v1432_v25 }
 0x213   : > { %v826_v18 = vsel %vm778_vm0, %v5395_v19, %v5393_v2  ;;  %v1568_v7 = vadd.f32 %v1536_v56, %v1139_v15  ;;  %v1569_v22 = vadd.f32 %v1537_v6, %v1140_v57  ;;  %v1005_v26 = vmul.f32 %v4363_v23, %v4643_v52 }
 0x214   : > { %v4761_v10 = vsel %vm875_vm1, %v5397_v38, %v5396_v33  ;;  %v5398_v46 = vmov %v5396_v33  ;;  %v1006_v27 = vmul.f32 %v4363_v23, %v4638_v35  ;;  %v1043_v17 = vmul.f32 %v4372_v43, %v5385_v41 }
 0x215   : > { %v4766_v60 = vsel %vm875_vm1, %v5398_v46, 0.0  ;;  %v1778_v21 = vpack.c.bf16 %v1759_v34, %v1758_v14  ;;  %v1600_v36 = vadd.f32 %v1568_v7, %v1499_v37  ;;  %v1601_v44 = vadd.f32 %v1569_v22, %v1500_v24  ;;  %v5399_v22 = vld [vmem:[#allocation34_spill] sm:$0xff] }
 0x216   : > { %v1044_v15 = vmul.f32 %v4372_v43, %v5383_v9  ;;  %v1073_v57 = vadd.f32 %v1043_v17, %v1005_v26  ;;  %v1111_v29 = vmul.f32 %v4391_v12, %v4657_v3  ;;  %v1112_v25 = vmul.f32 %v4391_v12, %v4660_v20 }
 0x217   : > { %v1181_v52 = vmul.f32 %v4398_v48, %v4702_v28  ;;  %2966 = vmatprep.mubr.bf16.mxu1 %v1778_v21  ;;  %v1632_v35 = vadd.f32 3.0, %v1600_v36  ;;  %v1633_v56 = vadd.f32 3.0, %v1601_v44  ;;  %v1182_v14 = vmul.f32 %v4398_v48, %v4696_v53 }
 0x218   : > { %v1074_v6 = vadd.f32 %v1044_v15, %v1006_v27  ;;  %v1141_v37 = vadd.f32 %v1111_v29, %v1073_v57  ;;  %v1221_v2 = vmul.f32 %v4407_v0, %v3932_v58  ;;  %v1222_v3 = vmul.f32 %v4407_v0, %v3938_v13  ;;  %v5400_v29 = vld [vmem:[#allocation33_spill] sm:$0xff] }
 0x219   : > { %v1293_v20 = vmul.f32 %v4539_v5, %v4712_v54  ;;  %v1664_v19 = vmax.f32 %v1632_v35, 0.0  ;;  %v1665_v33 = vmax.f32 %v1633_v56, 0.0  ;;  %v1294_v34 = vmul.f32 %v4539_v5, %v4715_v39  ;;  %v5401_v35 = vld [vmem:[#allocation37_spill] sm:$0xff] }
 0x21a   : > { %v1142_v38 = vadd.f32 %v1112_v25, %v1074_v6  ;;  %v1253_v24 = vadd.f32 %v1221_v2, %v1181_v52  ;;  %v1254_v7 = vadd.f32 %v1222_v3, %v1182_v14  ;;  %v1365_v46 = vmul.f32 %v4548_v55, %v5399_v22 }
 0x21b   : > { %v1366_v26 = vmul.f32 %v4548_v55, %v826_v18  ;;  %v1696_v27 = vmin.f32 %v1664_v19, 6.0  ;;  %v1697_v17 = vmin.f32 %v1665_v33, 6.0  ;;  %v1471_v0 = vmul.f32 %v4561_v1, %v4761_v10 }
 0x21c   : > { %v1472_v21 = vmul.f32 %v4561_v1, %v4766_v60  ;;  %v1325_v15 = vadd.f32 %v1293_v20, %v1253_v24  ;;  %v1326_v57 = vadd.f32 %v1294_v34, %v1254_v7  ;;  %v1433_v25 = vadd.f32 %v5400_v29, %v1365_v46 }
 0x21d   : > { %v1434_v52 = vadd.f32 %v5401_v35, %v1366_v26  ;;  %v1728_v56 = vmul.f32 %v1696_v27, %v1600_v36  ;;  %v1729_v6 = vmul.f32 %v1697_v17, %v1601_v44  ;;  %v1007_v14 = vmul.f32 %v4363_v23, %v4702_v28  ;;  %v5402_v17 = vld [vmem:[#allocation35_spill] sm:$0xff] }
 0x21e   : > { %v1008_v55 = vmul.f32 %v4363_v23, %v4696_v53  ;;  %v1501_v2 = vadd.f32 %v1471_v0, %v1433_v25  ;;  %v1538_v19 = vadd.f32 %v4570_v40, %v1325_v15  ;;  %v1539_v1 = vadd.f32 %v4570_v40, %v1326_v57  ;;  %v5403_v0 = vld [vmem:[#allocation32_spill] sm:$0xff] }
 0x21f   : > { %v1502_v3 = vadd.f32 %v1472_v21, %v1434_v52  ;;  %v1760_v20 = vmul.f32 0.16666667, %v1728_v56  ;;  %v1761_v33 = vmul.f32 0.16666667, %v1729_v6  ;;  %v1045_v34 = vmul.f32 %v4372_v43, %v3932_v58 }
 0x220   : > { %v1046_v36 = vmul.f32 %v4372_v43, %v3938_v13  ;;  %v1570_v44 = vadd.f32 %v1538_v19, %v1141_v37  ;;  %v1571_v24 = vadd.f32 %v1539_v1, %v1142_v38  ;;  %v1113_v28 = vmul.f32 %v4391_v12, %v4712_v54  ;;  %v3146_v54 = vld [vmem:[%s5255_s7] sm:$0xff]  }
 0x221   : > { %v1114_v23 = vmul.f32 %v4391_v12, %v4715_v39  ;;  %v1779_v53 = vpack.c.bf16 %v1761_v33, %v1760_v20  ;;  %v1075_v7 = vadd.f32 %v1045_v34, %v1007_v14  ;;  %v1184_v46 = vmul.f32 %v4398_v48, %v826_v18  ;;  %v5404_v12 = vld [vmem:[#allocation36_spill] sm:$0xff] }
 0x222   : > { %v1076_v22 = vadd.f32 %v1046_v36, %v1008_v55  ;;  %v1602_v26 = vadd.f32 %v1570_v44, %v1501_v2  ;;  %v1603_v27 = vadd.f32 %v1571_v24, %v1502_v3  ;;  %v1255_v21 = vadd.f32 %v5403_v0, %v5402_v17 }
 0x223   : > { %v1295_v43 = vmul.f32 %v4539_v5, %v4761_v10  ;;  %2967 = vmatmul.mubr.bf16.gmra.mrb[40].mxu1 %v1779_v53  ;;  %v1143_v37 = vadd.f32 %v1113_v28, %v1075_v7  ;;  %v1256_v39 = vadd.f32 %v5404_v12, %v1184_v46  ;;  %v1296_v38 = vmul.f32 %v4539_v5, %v4766_v60  ;;  %v3147_v53 = vld [vmem:[%s5255_s7 + $0x8] sm:$0xff]   ;;  %v3148_v46 = vld [vmem:[%s5255_s7 + $0x10] sm:$0xff]  }
 0x224   : > { %v1634_v48 = vadd.f32 3.0, %v1602_v26  ;;  %v1635_v18 = vadd.f32 3.0, %v1603_v27  ;;  %v1144_v57 = vadd.f32 %v1114_v23, %v1076_v22  ;;  %v3340_v25 = vmov 0.0  }
 0x225   : > { %v1327_v15 = vadd.f32 %v1295_v43, %v1255_v21  ;;  %v1328_v29 = vadd.f32 %v1296_v38, %v1256_v39  ;;  %2974 = vmatprep.subr.bf16.mxu1 %v3340_v25  ;;  %v3149_v21 = vld [vmem:[%s5255_s7 + $0x18] sm:$0xff]   ;;  %v3150_v39 = vld [vmem:[%s5255_s7 + $0x20] sm:$0xff]  }
 0x226   : > { %v1666_v10 = vmax.f32 %v1634_v48, 0.0  ;;  %v1667_v35 = vmax.f32 %v1635_v18, 0.0  ;;  %2975 = vmatpush3.bf16.msra.mxu1 %v3146_v54 }
 0x227   : > { %v1540_v52 = vadd.f32 %v4570_v40, %v1327_v15  ;;  %v1541_v56 = vadd.f32 %v4570_v40, %v1328_v29  ;;  %2976 = vmatprep.subr.bf16.mxu1 %v3340_v25 }
 0x228   : > { %v1698_v6 = vmin.f32 %v1666_v10, 6.0  ;;  %v1699_v14 = vmin.f32 %v1667_v35, 6.0  ;;  %v5405_v35 = vld [vmem:[#allocation18_spill] sm:$0xff] }
 0x229   : > { %v1572_v5 = vadd.f32 %v1540_v52, %v1143_v37  ;;  %v1573_v60 = vadd.f32 %v1541_v56, %v1144_v57  ;;  %v4849_v57 = vld [vmem:[%s5254_s6] ss:$0 sm:$0xff]  ;;  %v3151_v56 = vld [vmem:[%s5255_s7 + $0x28] sm:$0xff]  }
 0x22a   : > { %v1730_v55 = vmul.f32 %v1698_v6, %v1602_v26  ;;  %v1731_v2 = vmul.f32 %v1699_v14, %v1603_v27  ;;  %2977 = vmatpush3.bf16.msra.mxu1 %v3147_v53  ;;  %v5406_v14 = vld [vmem:[#allocation17_spill] sm:$0xff] }
 0x22b   : > { %v1636_v3 = vadd.f32 3.0, %v1572_v5  ;;  %v1637_v19 = vadd.f32 3.0, %v1573_v60  ;;  %2978 = vmatprep.subr.bf16.mxu1 %v3340_v25 }
 0x22c   : > { %v1762_v1 = vmul.f32 0.16666667, %v1730_v55  ;;  %v1763_v20 = vmul.f32 0.16666667, %v1731_v2 }
 0x22d   : > { %v1668_v33 = vmax.f32 %v1636_v3, 0.0  ;;  %v1669_v34 = vmax.f32 %v1637_v19, 0.0  ;;  %v3153_v19 = vld [vmem:[%s5255_s7 + $0x38] sm:$0xff]  }
 0x22e   : > { %v1780_v36 = vpack.c.bf16 %v1763_v20, %v1762_v1  ;;  %2979 = vmatpush3.bf16.msra.mxu1 %v3148_v46 }
 0x22f   : > { %v1700_v44 = vmin.f32 %v1668_v33, 6.0  ;;  %v1701_v24 = vmin.f32 %v1669_v34, 6.0  ;;  %2980 = vmatprep.subr.bf16.mxu1 %v3340_v25 }
 0x230   : > { %2970 = vmatprep.mubr.bf16.mxu1 %v1780_v36 }
 0x231   : > { %v1732_v28 = vmul.f32 %v1700_v44, %v1572_v5  ;;  %v1733_v40 = vmul.f32 %v1701_v24, %v1573_v60  ;;  %v3152_v60 = vld [vmem:[%s5255_s7 + $0x30] sm:$0xff]   ;;  %v5407_v24 = vld [vmem:[#allocation20_spill] sm:$0xff] }
 0x232   : > { %2981 = vmatpush3.bf16.msra.mxu1 %v3149_v21 }
 0x233   : > { %v1764_v23 = vmul.f32 0.16666667, %v1732_v28  ;;  %v1765_v7 = vmul.f32 0.16666667, %v1733_v40  ;;  %2982 = vmatprep.subr.bf16.mxu1 %v3340_v25 }
 0x235   : > { %v1781_v22 = vpack.c.bf16 %v1765_v7, %v1764_v23  ;;  %v5408_v7 = vld [vmem:[#allocation21_spill] sm:$0xff] }
 0x236   : > { %2983 = vmatpush3.bf16.msra.mxu1 %v3150_v39 }
 0x237   : > { %2971 = vmatmul.mubr.bf16.gmra.mrb[44].mxu1 %v1781_v22  ;;  %2984 = vmatprep.subr.bf16.mxu1 %v3340_v25 }
 0x238   : > { %2990 = vmatprep.mubr.msk.bf16.mxu1 %vm3341_vm2, %v3340_v25 }
 0x23a   : > { %2985 = vmatpush3.bf16.msra.mxu1 %v3151_v56 }
 0x23b   : > { %2986 = vmatprep.subr.bf16.mxu1 %v3340_v25 }
 0x23e   : > { %2987 = vmatpush3.bf16.msra.mxu1 %v3152_v60 }
 0x23f   : > { %2988 = vmatprep.subr.bf16.mxu1 %v3340_v25 }
 0x242   : > { %2989 = vmatpush3.bf16.msra.mxu1 %v3153_v19 }
 0x243   : > { %2994 = vmatprep.subr.bf16.mxu1 %v3340_v25 }
 0x24d   : > { %v2944_v26 = vpop.f32.mrb[16].mxu1 }
 0x24e   : > { %v1887_v27 = vpop.f32.mrb[17].mxu1  ;;  %v1896_v6 = vadd.f32 %v2944_v26, %v4849_v57 }
 0x24f   : > { %v2945_v17 = vpop.f32.mrb[18].mxu1  ;;  %v1888_v10 = vadd.f32 %v4849_v57, %v1887_v27 }
 0x250   : > { %v1890_v0 = vpop.f32.mrb[19].mxu1  ;;  %v4872_v2 = vadd.f32 %v1896_v6, %v3634_v4  ;;  %v1899_v3 = vadd.f32 %v2945_v17, %v4849_v57 }
 0x251   : > { %v1891_v29 = vadd.f32 %v4849_v57, %v1890_v0  ;;  %v4863_v5 = vadd.f32 %v1888_v10, %v5406_v14 }
 0x252   : > { %v4882_v36 = vadd.f32 %v1899_v3, %v3657_v16 }
 0x253   : > { %v4854_v52 = vadd.f32 %v1891_v29, %v5405_v35 }
 0x255   : > { %v2046_v55 = vadd.f32 %v4854_v52, %v4863_v5 }
 0x257   : > { %v2047_v1 = vadd.f32 %v2046_v55, %v4872_v2 }
 0x259   : > { %v2048_v40 = vadd.f32 %v2047_v1, %v4882_v36 }
 0x26a   : > { %v2948_v43 = vpop.f32.mrb[20].mxu1 }
 0x26b   : > { %v1903_v54 = vpop.f32.mrb[21].mxu1  ;;  %v1912_v16 = vadd.f32 %v2948_v43, %v4849_v57 }
 0x26c   : > { %v2949_v37 = vpop.f32.mrb[22].mxu1  ;;  %v1904_v20 = vadd.f32 %v4849_v57, %v1903_v54 }
 0x26d   : > { %v1906_v12 = vpop.f32.mrb[23].mxu1  ;;  %v4897_v26 = vadd.f32 %v1912_v16, %v3724_v47  ;;  %v1915_v27 = vadd.f32 %v2949_v37, %v4849_v57 }
 0x26e   : > { %v4886_v28 = vadd.f32 %v1904_v20, %v5407_v24  ;;  %v1907_v23 = vadd.f32 %v4849_v57, %v1906_v12  ;;  %v5409_v20 = vld [vmem:[#allocation30_spill] sm:$0xff] }
 0x26f   : > { %v4903_v21 = vadd.f32 %v1915_v27, %v3742_v59 }
 0x270   : > { %v2049_v53 = vadd.f32 %v2048_v40, %v4886_v28  ;;  %v4892_v22 = vadd.f32 %v1907_v23, %v5408_v7 }
 0x272   : > { %v2050_v46 = vadd.f32 %v2049_v53, %v4892_v22 }
 0x274   : > { %v2051_v17 = vadd.f32 %v2050_v46, %v4897_v26  ;;  %v5410_v46 = vld [vmem:[#allocation16_spill] sm:$0xff] }
 0x276   : > { %v2052_v12 = vadd.f32 %v2051_v17, %v4903_v21 }
 0x286   : > { %v2952_v38 = vpop.f32.mrb[24].mxu1 }
 0x287   : > { %v1919_v48 = vpop.f32.mrb[25].mxu1  ;;  %v1928_v37 = vadd.f32 %v2952_v38, %v4849_v57 }
 0x288   : > { %v2953_v18 = vpop.f32.mrb[26].mxu1  ;;  %v1920_v0 = vadd.f32 %v4849_v57, %v1919_v48 }
 0x289   : > { %v1922_v15 = vpop.f32.mrb[27].mxu1  ;;  %v1931_v56 = vadd.f32 %v2953_v18, %v4849_v57 }
 0x28a   : > { %v4906_v54 = vadd.f32 %v1920_v0, %v3796_v50  ;;  %v1923_v43 = vadd.f32 %v4849_v57, %v1922_v15  ;;  %v4917_v50 = vadd.f32 %v1928_v37, %v3792_v62 }
 0x28c   : > { %v2053_v39 = vadd.f32 %v2052_v12, %v4906_v54  ;;  %v4912_v47 = vadd.f32 %v1923_v43, %v3822_v31  ;;  %v4923_v31 = vadd.f32 %v1931_v56, %v3814_v30  ;;  %v5411_v12 = vld [vmem:[#allocation19_spill] sm:$0xff] }
 0x28e   : > { %v2054_v48 = vadd.f32 %v2053_v39, %v4912_v47  ;;  %v5412_v39 = vld [vmem:[#allocation23_spill] sm:$0xff] }
 0x290   : > { %v2055_v15 = vadd.f32 %v2054_v48, %v4917_v50  ;;  %v5413_v48 = vld [vmem:[#allocation25_spill] sm:$0xff] }
 0x292   : > { %v2056_v14 = vadd.f32 %v2055_v15, %v4923_v31  ;;  %v5414_v15 = vld [vmem:[#allocation22_spill] sm:$0xff] }
 0x2a2   : > { %v2956_v33 = vpop.f32.mrb[28].mxu1 }
 0x2a3   : > { %v1935_v34 = vpop.f32.mrb[29].mxu1  ;;  %v1944_v18 = vadd.f32 %v2956_v33, %v4849_v57 }
 0x2a4   : > { %v2957_v4 = vpop.f32.mrb[30].mxu1  ;;  %v1936_v6 = vadd.f32 %v4849_v57, %v1935_v34 }
 0x2a5   : > { %v1938_v44 = vpop.f32.mrb[31].mxu1  ;;  %v4937_v19 = vadd.f32 %v1944_v18, %v3861_v45  ;;  %v1947_v30 = vadd.f32 %v2957_v4, %v4849_v57 }
 0x2a6   : > { %v4926_v38 = vadd.f32 %v1936_v6, %v3873_v8  ;;  %v1939_v60 = vadd.f32 %v4849_v57, %v1938_v44 }
 0x2a7   : > { %v4943_v34 = vadd.f32 %v1947_v30, %v5409_v20 }
 0x2a8   : > { %v2057_v55 = vadd.f32 %v2056_v14, %v4926_v38  ;;  %v4932_v62 = vadd.f32 %v1939_v60, %v3894_v61 }
 0x2aa   : > { %v2058_v3 = vadd.f32 %v2057_v55, %v4932_v62 }
 0x2ac   : > { %v2059_v8 = vadd.f32 %v2058_v3, %v4937_v19 }
 0x2ae   : > { %v2060_v61 = vadd.f32 %v2059_v8, %v4943_v34 }
 0x2be   : > { %v2960_v29 = vpop.f32.mrb[32].mxu1 }
 0x2bf   : > { %v1951_v10 = vpop.f32.mrb[33].mxu1  ;;  %v1960_v7 = vadd.f32 %v2960_v29, %v4849_v57 }
 0x2c0   : > { %v2961_v59 = vpop.f32.mrb[34].mxu1  ;;  %v1952_v1 = vadd.f32 %v4849_v57, %v1951_v10 }
 0x2c1   : > { %v1954_v35 = vpop.f32.mrb[35].mxu1  ;;  %v1963_v27 = vadd.f32 %v2961_v59, %v4849_v57 }
 0x2c2   : > { %v4946_v44 = vadd.f32 %v1952_v1, %v3648_v11  ;;  %v1955_v33 = vadd.f32 %v4849_v57, %v1954_v35  ;;  %v4957_v11 = vadd.f32 %v1960_v7, %v5410_v46  ;;  %v5415_v1 = vld [vmem:[#allocation24_spill] sm:$0xff] }
 0x2c3   : > { %v4963_v43 = vadd.f32 %v1963_v27, %v5411_v12 }
 0x2c4   : > { %v2061_v4 = vadd.f32 %v2060_v61, %v4946_v44  ;;  %v4952_v53 = vadd.f32 %v1955_v33, %v3711_v42 }
 0x2c6   : > { %v2062_v16 = vadd.f32 %v2061_v4, %v4952_v53 }
 0x2c8   : > { %v2063_v17 = vadd.f32 %v2062_v16, %v4957_v11 }
 0x2ca   : > { %v2064_v42 = vadd.f32 %v2063_v17, %v4963_v43 }
 0x2da   : > { %v2964_v24 = vpop.f32.mrb[36].mxu1 }
 0x2db   : > { %v1967_v40 = vpop.f32.mrb[37].mxu1  ;;  %v1976_v59 = vadd.f32 %v2964_v24, %v4849_v57 }
 0x2dc   : > { %v2965_v45 = vpop.f32.mrb[38].mxu1  ;;  %v1968_v0 = vadd.f32 %v4849_v57, %v1967_v40 }
 0x2dd   : > { %v1970_v23 = vpop.f32.mrb[39].mxu1  ;;  %v4977_v6 = vadd.f32 %v1976_v59, %v5414_v15  ;;  %v1979_v14 = vadd.f32 %v2965_v45, %v4849_v57 }
 0x2de   : > { %v4966_v37 = vadd.f32 %v1968_v0, %v5412_v39  ;;  %v1971_v29 = vadd.f32 %v4849_v57, %v1970_v23 }
 0x2df   : > { %v4983_v20 = vadd.f32 %v1979_v14, %v5415_v1  ;;  %v2764_v1 = vld [vmem:[%s5256_s8] ss:$0 sm:$0xff] }
 0x2e0   : > { %v2065_v10 = vadd.f32 %v2064_v42, %v4966_v37  ;;  %v4972_v35 = vadd.f32 %v1971_v29, %v5413_v48 }
 0x2e2   : > { %v2066_v56 = vadd.f32 %v2065_v10, %v4972_v35 }
 0x2e4   : > { %v2067_v18 = vadd.f32 %v2066_v56, %v4977_v6 }
 0x2e6   : > { %v2068_v33 = vadd.f32 %v2067_v18, %v4983_v20 }
 0x2f6   : > { %v2968_v60 = vpop.f32.mrb[40].mxu1 }
 0x2f7   : > { %v1983_v55 = vpop.f32.mrb[41].mxu1  ;;  %v1992_v23 = vadd.f32 %v2968_v60, %v4849_v57 }
 0x2f8   : > { %v1984_v3 = vadd.f32 %v4849_v57, %v1983_v55  ;;  %v2969_v30 = vpop.f32.mrb[42].mxu1 }
 0x2f9   : > { %v1986_v8 = vpop.f32.mrb[43].mxu1  ;;  %v4997_v7 = vadd.f32 %v1992_v23, %v5385_v41  ;;  %v1995_v16 = vadd.f32 %v2969_v30, %v4849_v57 }
 0x2fa   : > { %v4986_v61 = vadd.f32 %v1984_v3, %v5379_v49  ;;  %v1987_v24 = vadd.f32 %v4849_v57, %v1986_v8 }
 0x2fb   : > { %v5002_v46 = vadd.f32 %v1995_v16, %v5383_v9 }
 0x2fc   : > { %v2069_v40 = vadd.f32 %v2068_v33, %v4986_v61  ;;  %v4992_v45 = vadd.f32 %v1987_v24, %v5377_v51 }
 0x2fe   : > { %v2070_v4 = vadd.f32 %v2069_v40, %v4992_v45 }
 0x300   : > { %v2071_v49 = vadd.f32 %v2070_v4, %v4997_v7 }
 0x302   : > { %v2072_v51 = vadd.f32 %v2071_v49, %v5002_v46 }
 0x30a   : > { %v2972_v27 = vpop.f32.mrb[44].mxu1 }
 0x30b   : > { %v1999_v17 = vpop.f32.mrb[45].mxu1  ;;  %v2008_v42 = vadd.f32 %v2972_v27, %v4849_v57  ;;  %v3157_v27 = vld [vmem:[%s5259_s11 + $0x8] sm:$0xff]  }
 0x30c   : > { %v2000_v0 = vadd.f32 %v4849_v57, %v1999_v17  ;;  %v2973_v12 = vpop.f32.mrb[46].mxu1  ;;  %v3158_v17 = vld [vmem:[%s5259_s11 + $0x10] sm:$0xff]  }
 0x30d   : > { %v2002_v39 = vpop.f32.mrb[47].mxu1  ;;  %v2011_v9 = vadd.f32 %v2973_v12, %v4849_v57  ;;  %v5017_v59 = vadd.f32 %v2008_v42, %v5394_v32  ;;  %v3154_v32 = vld [vmem:[%s5257_s9] sm:$0xff]   ;;  %v3161_v12 = vld [vmem:[%s5259_s11 + $0x28] sm:$0xff]   ;;  %v3163_v42 = vld [vmem:[%s5259_s11 + $0x38] sm:$0xff]  }
 0x30e   : > { %v5008_v41 = vadd.f32 %v2000_v0, %v3932_v58  ;;  %v2003_v29 = vadd.f32 %v4849_v57, %v2002_v39  ;;  %v3159_v0 = vld [vmem:[%s5259_s11 + $0x18] sm:$0xff]   ;;  %v3162_v39 = vld [vmem:[%s5259_s11 + $0x30] sm:$0xff]  }
 0x30f   : > { %v5021_v15 = vadd.f32 %v2011_v9, %v3935_v63  ;;  %v3155_v63 = vld [vmem:[%s5257_s9 + $0x8] sm:$0xff]  }
 0x310   : > { %v2073_v10 = vadd.f32 %v2072_v51, %v5008_v41  ;;  %v5014_v48 = vadd.f32 %v2003_v29, %v3938_v13  ;;  %v3160_v51 = vld [vmem:[%s5259_s11 + $0x20] sm:$0xff]  }
 0x311   : > { %v2773_v29 = vld [vmem:[#allocation2] ss:$0 sm:$0xff] }
 0x312   : > { %v2074_v56 = vadd.f32 %v2073_v10, %v5014_v48 }
 0x314   : > { %v2075_v58 = vadd.f32 %v2074_v56, %v5017_v59 }
 0x316   : > { %v2076_v14 = vadd.f32 %v2075_v58, %v5021_v15 }
 0x318   : > { %v2077_v60 = vrot.slane %v2076_v14, 4 }
 0x31a   : > { %v2078_v55 = vadd.f32 %v2077_v60, %v2076_v14 }
 0x31c   : > { %v2079_v18 = vrot.slane %v2078_v55, 2 }
 0x31e   : > { %v2080_v3 = vadd.f32 %v2079_v18, %v2078_v55 }
 0x320   : > { %v2081_v57 = vrot.slane %v2080_v3, 1 }
 0x322   : > { %v2082_v30 = vadd.f32 %v2081_v57, %v2080_v3  ;;  %v2271_v3 = vlaneseq }
 0x324   : > { %v2083_v13 = vmul.f32 0.00390625, %v2082_v30  ;;  %v2272_v57 = vshrl.u32 %v2271_v3, 7 }
 0x326   : > { %v2084_v8 = vpack.c.bf16 %v2083_v13, %v2083_v13  ;;  %v2273_v30 = vsub.s32 0, %v2272_v57 }
 0x328   : > { %2991 = vmatmul.mubr.bf16.vlgmr.msra.gmra.mrb[48].mxu1 %v2084_v8 }
 0x329   : > { %2995 = vmatpush3.bf16.msra.mxu1 %v3154_v32  ;;  %2998 = vmatprep.mubr.msk.bf16.mxu1 %vm3341_vm2, %v3340_v25 }
 0x32a   : > { %2996 = vmatprep.subr.bf16.mxu1 %v3340_v25  ;;  %v3156_v25 = vld [vmem:[%s5259_s11] sm:$0xff]  }
 0x32b   : > { %3002 = vmatprep.subr.bf16.mxu0 %v3156_v25 }
 0x32c   : > { %3003 = vmatpush3.bf16.msra.mxu0 %v3156_v25 }
 0x32d   : > { %2997 = vmatpush3.bf16.msra.mxu1 %v3155_v63  ;;  %3004 = vmatprep.subr.bf16.mxu0 %v3157_v27 }
 0x330   : > { %3005 = vmatpush3.bf16.msra.mxu0 %v3157_v27 }
 0x331   : > { %3006 = vmatprep.subr.bf16.mxu0 %v3158_v17 }
 0x334   : > { %3007 = vmatpush3.bf16.msra.mxu0 %v3158_v17 }
 0x335   : > { %3008 = vmatprep.subr.bf16.mxu0 %v3159_v0 }
 0x338   : > { %3009 = vmatpush3.bf16.msra.mxu0 %v3159_v0 }
 0x339   : > { %3010 = vmatprep.subr.bf16.mxu0 %v3160_v51 }
 0x33c   : > { %3011 = vmatpush3.bf16.msra.mxu0 %v3160_v51 }
 0x33d   : > { %3012 = vmatprep.subr.bf16.mxu0 %v3161_v12 }
 0x340   : > { %3013 = vmatpush3.bf16.msra.mxu0 %v3161_v12 }
 0x341   : > { %3014 = vmatprep.subr.bf16.mxu0 %v3162_v39 }
 0x344   : > { %3015 = vmatpush3.bf16.msra.mxu0 %v3162_v39 }
 0x345   : > { %3016 = vmatprep.subr.bf16.mxu0 %v3163_v42 }
 0x348   : > { %3017 = vmatpush3.bf16.msra.mxu0 %v3163_v42 }
 0x3fb   : > { %v2190_v33 = vpop.f32.mrb[48].mxu1 }
 0x3fc   : > { %v2191_v24 = vadd.f32 %v2764_v1, %v2190_v33  ;;  %v2992_v40 = vpop.f32.mrb[49].mxu1 }
 0x3fd   : > { %v2193_v23 = vpop.f32.mrb[50].mxu1 }
 0x3fe   : > { %v2196_v4 = vmax.f32 %v2191_v24, 0.0  ;;  %v2993_v16 = vpop.f32.mrb[51].mxu1 }
 0x400   : > { %v2197_v49 = vpack.c.bf16 %v2196_v4, %v2196_v4 }
 0x402   : > { %2999 = vmatmul.mubr.msk.bf16.vlgmr.msra.gmra.mrb[52].mxu1 %vm2221_vm3, %v2197_v49 }
 0x4d5   : > { %v2259_v10 = vpop.f32.mrb[52].mxu1 }
 0x4d6   : > { %v2260_v9 = vadd.f32 %v2773_v29, %v2259_v10  ;;  %v3000_v56 = vpop.f32.mrb[53].mxu1 }
 0x4d7   : > { %v2262_v58 = vpop.f32.mrb[54].mxu1 }
 0x4d8   : > { %v2777_v14 = vmul.f32 -1.442695, %v2260_v9  ;;  %v3001_v60 = vpop.f32.mrb[55].mxu1 }
 0x4da   : > { %3164 = vpow2.f32 %v2777_v14 }
 0x4e4   : > { %v3165_v55 = vpop.eup %3164 }
 0x4e5   : > { %v2268_v18 = vadd.f32 1.0, %v3165_v55 }
 0x4e7   : > { %3166 = vrcp.f32 %v2268_v18  ;;  %v3179_v18 = vld [vmem:[%s3550_s25] sm:$0xff] }
 0x4f1   : > { %v3167_v13 = vpop.eup %3166 }
 0x4f2   : > { %v2274_v32 = vrot.slane %v3167_v13, %v2273_v30  ;;  %v3180_v30 = vld [vmem:[%s3550_s25 + $0x18] sm:$0xff] }
 0x4f4   : > { %v2275_v8 = vmul.f32 %v2274_v32, %v4863_v5  ;;  %v2276_v63 = vmul.f32 %v2274_v32, %v4854_v52  ;;  %v2277_v1 = vmul.f32 %v2274_v32, %v4872_v2  ;;  %v2278_v33 = vmul.f32 %v2274_v32, %v4882_v36 }
 0x4f5   : > { %v2279_v24 = vmul.f32 %v2274_v32, %v4886_v28  ;;  %v2280_v40 = vmul.f32 %v2274_v32, %v4892_v22  ;;  %v2281_v49 = vmul.f32 %v2274_v32, %v4897_v26  ;;  %v2282_v5 = vmul.f32 %v2274_v32, %v4903_v21 }
 0x4f6   : > { %v2308_v23 = vpack.c.bf16 %v2278_v33, %v2277_v1  ;;  %v2307_v4 = vpack.c.bf16 %v2276_v63, %v2275_v8  ;;  %v2283_v52 = vmul.f32 %v2274_v32, %v4906_v54  ;;  %v2284_v2 = vmul.f32 %v2274_v32, %v4912_v47 }
 0x4f7   : > { %v2309_v16 = vpack.c.bf16 %v2280_v40, %v2279_v24  ;;  %v2310_v25 = vpack.c.bf16 %v2282_v5, %v2281_v49  ;;  %v2285_v28 = vmul.f32 %v2274_v32, %v4917_v50  ;;  %v2286_v22 = vmul.f32 %v2274_v32, %v4923_v31  ;;  %v3183_v5 = vld [vmem:[%s3550_s25 + $0x20] sm:$0xff] }
 0x4f8   : > { %3018 = vmatprep.mubr.bf16.mxu0 %v2307_v4  ;;  %v2311_v36 = vpack.c.bf16 %v2284_v2, %v2283_v52  ;;  %v2287_v27 = vmul.f32 %v2274_v32, %v4926_v38  ;;  %v2288_v17 = vmul.f32 %v2274_v32, %v4932_v62  ;;  %v2289_v21 = vmul.f32 %v2274_v32, %v4937_v19 }
 0x4f9   : > { %3019 = vmatmul.mubr.bf16.vlgmr.msra.gmra.mrb[16].mxu0 %v2308_v23  ;;  %v2312_v0 = vpack.c.bf16 %v2286_v22, %v2285_v28  ;;  %v2290_v54 = vmul.f32 %v2274_v32, %v4943_v34  ;;  %v2291_v47 = vmul.f32 %v2274_v32, %v4946_v44  ;;  %v2292_v51 = vmul.f32 %v2274_v32, %v4952_v53  ;;  %v3182_v23 = vld [vmem:[%s3550_s25 + $0x30] sm:$0xff]  ;;  %v3185_v28 = vld [vmem:[%s3550_s25 + $0x28] sm:$0xff] }
 0x4fa   : > { %3022 = vmatprep.mubr.bf16.mxu0 %v2309_v16  ;;  %v2313_v26 = vpack.c.bf16 %v2288_v17, %v2287_v27  ;;  %v2293_v31 = vmul.f32 %v2274_v32, %v4957_v11  ;;  %v2294_v38 = vmul.f32 %v2274_v32, %v4963_v43  ;;  %v2295_v62 = vmul.f32 %v2274_v32, %v4966_v37 }
 0x4fb   : > { %v2314_v12 = vpack.c.bf16 %v2290_v54, %v2289_v21  ;;  %v2315_v50 = vpack.c.bf16 %v2292_v51, %v2291_v47  ;;  %v2296_v39 = vmul.f32 %v2274_v32, %v4972_v35  ;;  %v2297_v34 = vmul.f32 %v2274_v32, %v4977_v6  ;;  %v3186_v54 = vld [vmem:[%s3550_s25 + $0x50] sm:$0xff] }
 0x4fc   : > { %v2316_v42 = vpack.c.bf16 %v2294_v38, %v2293_v31  ;;  %v2298_v44 = vmul.f32 %v2274_v32, %v4983_v20  ;;  %v2299_v53 = vmul.f32 %v2274_v32, %v4986_v61  ;;  %v2300_v29 = vmul.f32 %v2274_v32, %v4992_v45 }
 0x4fd   : > { %v2317_v19 = vpack.c.bf16 %v2296_v39, %v2295_v62  ;;  %v2301_v43 = vmul.f32 %v2274_v32, %v4997_v7  ;;  %v2302_v37 = vmul.f32 %v2274_v32, %v5002_v46  ;;  %v2303_v35 = vmul.f32 %v2274_v32, %v5008_v41  ;;  %v5094_v7 = vld [vmem:[#allocation5] ss:$0 sm:$0xff]  ;;  %v3188_v62 = vld [vmem:[%s3550_s25 + $0x58] sm:$0xff] }
 0x4fe   : > { %v2318_v10 = vpack.c.bf16 %v2298_v44, %v2297_v34  ;;  %v2319_v11 = vpack.c.bf16 %v2300_v29, %v2299_v53  ;;  %v2304_v6 = vmul.f32 %v2274_v32, %v5014_v48  ;;  %v2305_v61 = vmul.f32 %v2274_v32, %v5017_v59  ;;  %v3178_v59 = vld [vmem:[%s3550_s25 + $0x10] sm:$0xff] }
 0x4ff   : > { %v2320_v9 = vpack.c.bf16 %v2302_v37, %v2301_v43  ;;  %v2306_v45 = vmul.f32 %v2274_v32, %v5021_v15  ;;  %v3181_v32 = vld [vmem:[%s3550_s25 + $0x8] sm:$0xff] }
 0x500   : > { %v2321_v20 = vpack.c.bf16 %v2304_v6, %v2303_v35  ;;  %v3191_v6 = vld [vmem:[%s3550_s25 + $0x60] sm:$0xff] }
 0x501   : > { %3023 = vmatmul.mubr.bf16.gmra.mrb[20].mxu0 %v2310_v25  ;;  %v2322_v56 = vpack.c.bf16 %v2306_v45, %v2305_v61  ;;  %v3184_v25 = vld [vmem:[%s3550_s25 + $0x38] sm:$0xff] }
 0x502   : > { %3026 = vmatprep.mubr.bf16.mxu0 %v2311_v36  ;;  %v3192_v61 = vld [vmem:[%s3550_s25 + $0x78] sm:$0xff] }
 0x509   : > { %3027 = vmatmul.mubr.bf16.gmra.mrb[24].mxu0 %v2312_v0 }
 0x50a   : > { %3030 = vmatprep.mubr.bf16.mxu0 %v2313_v26 }
 0x511   : > { %3031 = vmatmul.mubr.bf16.gmra.mrb[28].mxu0 %v2314_v12 }
 0x512   : > { %3034 = vmatprep.mubr.bf16.mxu0 %v2315_v50  ;;  %v3187_v50 = vld [vmem:[%s3550_s25 + $0x40] sm:$0xff] }
 0x519   : > { %3035 = vmatmul.mubr.bf16.gmra.mrb[32].mxu0 %v2316_v42  ;;  %v3189_v42 = vld [vmem:[%s3550_s25 + $0x48] sm:$0xff] }
 0x51a   : > { %3038 = vmatprep.mubr.bf16.mxu0 %v2317_v19 }
 0x521   : > { %3039 = vmatmul.mubr.bf16.gmra.mrb[36].mxu0 %v2318_v10 }
 0x522   : > { %3042 = vmatprep.mubr.bf16.mxu0 %v2319_v11  ;;  %v3190_v11 = vld [vmem:[%s3550_s25 + $0x70] sm:$0xff] }
 0x529   : > { %3043 = vmatmul.mubr.bf16.gmra.mrb[40].mxu0 %v2320_v9 }
 0x52a   : > { %3046 = vmatprep.mubr.bf16.mxu0 %v2321_v20 }
 0x531   : > { %3047 = vmatmul.mubr.bf16.gmra.mrb[44].mxu0 %v2322_v56  ;;  %v3193_v56 = vld [vmem:[%s3550_s25 + $0x68] sm:$0xff] }
 0x5cc   : > { %v3020_v46 = vpop.f32.mrb[16].mxu0 }
 0x5cd   : > { %v2437_v41 = vadd.f32 %v3020_v46, %v5094_v7  ;;  %v2428_v48 = vpop.f32.mrb[17].mxu0 }
 0x5ce   : > { %v2429_v58 = vadd.f32 %v5094_v7, %v2428_v48  ;;  %v3021_v14 = vpop.f32.mrb[18].mxu0 }
 0x5cf   : > { %v2557_v60 = vadd.f32 %v3178_v59, %v2437_v41  ;;  %v2440_v15 = vadd.f32 %v3021_v14, %v5094_v7  ;;  %v2431_v55 = vpop.f32.mrb[19].mxu0 }
 0x5d0   : > { %v2555_v3 = vadd.f32 %v3179_v18, %v2429_v58  ;;  %v2432_v57 = vadd.f32 %v5094_v7, %v2431_v55 }
 0x5d1   : > { %2589 = vst [vmem:[%s5104_s30 + $0x10] sm:$0xff] %v2557_v60  ;;  %v2558_v13 = vadd.f32 %v3180_v30, %v2440_v15  ;;  %v3194_v60 = vld [vmem:[%s3550_s25 + $0x90] sm:$0xff] }
 0x5d2   : > { %2587 = vst [vmem:[%s5104_s30] sm:$0xff] %v2555_v3  ;;  %v2556_v8 = vadd.f32 %v3181_v32, %v2432_v57  ;;  %v3195_v3 = vld [vmem:[%s3550_s25 + $0x80] sm:$0xff] }
 0x5d3   : > { %2590 = vst [vmem:[%s5104_s30 + $0x18] sm:$0xff] %v2558_v13  ;;  %v3196_v13 = vld [vmem:[%s3550_s25 + $0x98] sm:$0xff] }
 0x5d4   : > { %2588 = vst [vmem:[%s5104_s30 + $0x8] sm:$0xff] %v2556_v8  ;;  %v3024_v63 = vpop.f32.mrb[20].mxu0  ;;  %v3197_v8 = vld [vmem:[%s3550_s25 + $0x88] sm:$0xff] }
 0x5d5   : > { %v2453_v1 = vadd.f32 %v3024_v63, %v5094_v7  ;;  %v2444_v33 = vpop.f32.mrb[21].mxu0 }
 0x5d6   : > { %v2445_v24 = vadd.f32 %v5094_v7, %v2444_v33  ;;  %v3025_v40 = vpop.f32.mrb[22].mxu0 }
 0x5d7   : > { %v2561_v4 = vadd.f32 %v3182_v23, %v2453_v1  ;;  %v2456_v16 = vadd.f32 %v3025_v40, %v5094_v7  ;;  %v2447_v49 = vpop.f32.mrb[23].mxu0 }
 0x5d8   : > { %v2559_v52 = vadd.f32 %v3183_v5, %v2445_v24  ;;  %v2448_v2 = vadd.f32 %v5094_v7, %v2447_v49 }
 0x5d9   : > { %2593 = vst [vmem:[%s5104_s30 + $0x30] sm:$0xff] %v2561_v4  ;;  %v2562_v36 = vadd.f32 %v3184_v25, %v2456_v16  ;;  %v3198_v4 = vld [vmem:[%s3550_s25 + $0xb0] sm:$0xff] }
 0x5da   : > { %2591 = vst [vmem:[%s5104_s30 + $0x20] sm:$0xff] %v2559_v52  ;;  %v2560_v22 = vadd.f32 %v3185_v28, %v2448_v2  ;;  %v3199_v52 = vld [vmem:[%s3550_s25 + $0xa0] sm:$0xff] }
 0x5db   : > { %2594 = vst [vmem:[%s5104_s30 + $0x38] sm:$0xff] %v2562_v36  ;;  %v3200_v36 = vld [vmem:[%s3550_s25 + $0xb8] sm:$0xff] }
 0x5dc   : > { %2592 = vst [vmem:[%s5104_s30 + $0x28] sm:$0xff] %v2560_v22  ;;  %v3028_v27 = vpop.f32.mrb[24].mxu0  ;;  %v3201_v22 = vld [vmem:[%s3550_s25 + $0xa8] sm:$0xff] }
 0x5dd   : > { %v2469_v17 = vadd.f32 %v3028_v27, %v5094_v7  ;;  %v2460_v0 = vpop.f32.mrb[25].mxu0 }
 0x5de   : > { %v2461_v26 = vadd.f32 %v5094_v7, %v2460_v0  ;;  %v3029_v21 = vpop.f32.mrb[26].mxu0 }
 0x5df   : > { %v2565_v47 = vadd.f32 %v3186_v54, %v2469_v17  ;;  %v2472_v51 = vadd.f32 %v3029_v21, %v5094_v7  ;;  %v2463_v12 = vpop.f32.mrb[27].mxu0 }
 0x5e0   : > { %v2563_v31 = vadd.f32 %v3187_v50, %v2461_v26  ;;  %v2464_v38 = vadd.f32 %v5094_v7, %v2463_v12 }
 0x5e1   : > { %2597 = vst [vmem:[%s5104_s30 + $0x50] sm:$0xff] %v2565_v47  ;;  %v2566_v39 = vadd.f32 %v3188_v62, %v2472_v51  ;;  %v3202_v47 = vld [vmem:[%s3550_s25 + $0xd0] sm:$0xff] }
 0x5e2   : > { %2595 = vst [vmem:[%s5104_s30 + $0x40] sm:$0xff] %v2563_v31  ;;  %v2564_v19 = vadd.f32 %v3189_v42, %v2464_v38  ;;  %v3203_v31 = vld [vmem:[%s3550_s25 + $0xc0] sm:$0xff] }
 0x5e3   : > { %2598 = vst [vmem:[%s5104_s30 + $0x58] sm:$0xff] %v2566_v39  ;;  %v3204_v39 = vld [vmem:[%s3550_s25 + $0xd8] sm:$0xff] }
 0x5e4   : > { %2596 = vst [vmem:[%s5104_s30 + $0x48] sm:$0xff] %v2564_v19  ;;  %v3032_v34 = vpop.f32.mrb[28].mxu0  ;;  %v3205_v19 = vld [vmem:[%s3550_s25 + $0xc8] sm:$0xff] }
 0x5e5   : > { %v2485_v44 = vadd.f32 %v3032_v34, %v5094_v7  ;;  %v2476_v53 = vpop.f32.mrb[29].mxu0 }
 0x5e6   : > { %v2477_v29 = vadd.f32 %v5094_v7, %v2476_v53  ;;  %v3033_v10 = vpop.f32.mrb[30].mxu0 }
 0x5e7   : > { %v2569_v43 = vadd.f32 %v3190_v11, %v2485_v44  ;;  %v2488_v37 = vadd.f32 %v3033_v10, %v5094_v7  ;;  %v2479_v35 = vpop.f32.mrb[31].mxu0 }
 0x5e8   : > { %v2567_v9 = vadd.f32 %v3191_v6, %v2477_v29  ;;  %v2480_v20 = vadd.f32 %v5094_v7, %v2479_v35 }
 0x5e9   : > { %2601 = vst [vmem:[%s5104_s30 + $0x70] sm:$0xff] %v2569_v43  ;;  %v2570_v45 = vadd.f32 %v3192_v61, %v2488_v37  ;;  %v3206_v43 = vld [vmem:[%s3550_s25 + $0xf0] sm:$0xff] }
 0x5ea   : > { %2599 = vst [vmem:[%s5104_s30 + $0x60] sm:$0xff] %v2567_v9  ;;  %v2568_v46 = vadd.f32 %v3193_v56, %v2480_v20  ;;  %v3207_v9 = vld [vmem:[%s3550_s25 + $0xe0] sm:$0xff] }
 0x5eb   : > { %2602 = vst [vmem:[%s5104_s30 + $0x78] sm:$0xff] %v2570_v45  ;;  %v3208_v45 = vld [vmem:[%s3550_s25 + $0xf8] sm:$0xff] }
 0x5ec   : > { %2600 = vst [vmem:[%s5104_s30 + $0x68] sm:$0xff] %v2568_v46  ;;  %v3036_v41 = vpop.f32.mrb[32].mxu0  ;;  %v3209_v46 = vld [vmem:[%s3550_s25 + $0xe8] sm:$0xff] }
 0x5ed   : > { %v2501_v48 = vadd.f32 %v3036_v41, %v5094_v7  ;;  %v2492_v58 = vpop.f32.mrb[33].mxu0 }
 0x5ee   : > { %v2493_v14 = vadd.f32 %v5094_v7, %v2492_v58  ;;  %v3037_v59 = vpop.f32.mrb[34].mxu0 }
 0x5ef   : > { %v2573_v15 = vadd.f32 %v3194_v60, %v2501_v48  ;;  %v2504_v55 = vadd.f32 %v3037_v59, %v5094_v7  ;;  %v2495_v18 = vpop.f32.mrb[35].mxu0 }
 0x5f0   : > { %v2571_v57 = vadd.f32 %v3195_v3, %v2493_v14  ;;  %v2496_v30 = vadd.f32 %v5094_v7, %v2495_v18 }
 0x5f1   : > { %2605 = vst [vmem:[%s5104_s30 + $0x90] sm:$0xff] %v2573_v15  ;;  %v2574_v32 = vadd.f32 %v3196_v13, %v2504_v55 }
 0x5f2   : > { %2603 = vst [vmem:[%s5104_s30 + $0x80] sm:$0xff] %v2571_v57  ;;  %v2572_v63 = vadd.f32 %v3197_v8, %v2496_v30 }
 0x5f3   : > { %2606 = vst [vmem:[%s5104_s30 + $0x98] sm:$0xff] %v2574_v32 }
 0x5f4   : > { %2604 = vst [vmem:[%s5104_s30 + $0x88] sm:$0xff] %v2572_v63  ;;  %v3040_v1 = vpop.f32.mrb[36].mxu0 }
 0x5f5   : > { %v2517_v33 = vadd.f32 %v3040_v1, %v5094_v7  ;;  %v2508_v24 = vpop.f32.mrb[37].mxu0 }
 0x5f6   : > { %v2509_v40 = vadd.f32 %v5094_v7, %v2508_v24  ;;  %v3041_v23 = vpop.f32.mrb[38].mxu0 }
 0x5f7   : > { %v2577_v16 = vadd.f32 %v3198_v4, %v2517_v33  ;;  %v2520_v49 = vadd.f32 %v3041_v23, %v5094_v7  ;;  %v2511_v5 = vpop.f32.mrb[39].mxu0 }
 0x5f8   : > { %v2575_v2 = vadd.f32 %v3199_v52, %v2509_v40  ;;  %v2512_v25 = vadd.f32 %v5094_v7, %v2511_v5 }
 0x5f9   : > { %2609 = vst [vmem:[%s5104_s30 + $0xb0] sm:$0xff] %v2577_v16  ;;  %v2578_v28 = vadd.f32 %v3200_v36, %v2520_v49 }
 0x5fa   : > { %2607 = vst [vmem:[%s5104_s30 + $0xa0] sm:$0xff] %v2575_v2  ;;  %v2576_v27 = vadd.f32 %v3201_v22, %v2512_v25 }
 0x5fb   : > { %2610 = vst [vmem:[%s5104_s30 + $0xb8] sm:$0xff] %v2578_v28 }
 0x5fc   : > { %2608 = vst [vmem:[%s5104_s30 + $0xa8] sm:$0xff] %v2576_v27  ;;  %v3044_v17 = vpop.f32.mrb[40].mxu0 }
 0x5fd   : > { %v2533_v0 = vadd.f32 %v3044_v17, %v5094_v7  ;;  %v2524_v26 = vpop.f32.mrb[41].mxu0 }
 0x5fe   : > { %v2525_v21 = vadd.f32 %v5094_v7, %v2524_v26  ;;  %v3045_v54 = vpop.f32.mrb[42].mxu0 }
 0x5ff   : > { %v2581_v51 = vadd.f32 %v3202_v47, %v2533_v0  ;;  %v2536_v12 = vadd.f32 %v3045_v54, %v5094_v7  ;;  %v2527_v50 = vpop.f32.mrb[43].mxu0 }
 0x600   : > { %v2579_v38 = vadd.f32 %v3203_v31, %v2525_v21  ;;  %v2528_v62 = vadd.f32 %v5094_v7, %v2527_v50 }
 0x601   : > { %2613 = vst [vmem:[%s5104_s30 + $0xd0] sm:$0xff] %v2581_v51  ;;  %v2582_v42 = vadd.f32 %v3204_v39, %v2536_v12 }
 0x602   : > { %2611 = vst [vmem:[%s5104_s30 + $0xc0] sm:$0xff] %v2579_v38  ;;  %v2580_v34 = vadd.f32 %v3205_v19, %v2528_v62 }
 0x603   : > { %2614 = vst [vmem:[%s5104_s30 + $0xd8] sm:$0xff] %v2582_v42 }
 0x604   : > { %2612 = vst [vmem:[%s5104_s30 + $0xc8] sm:$0xff] %v2580_v34  ;;  %v3048_v44 = vpop.f32.mrb[44].mxu0 }
 0x605   : > { %v2549_v53 = vadd.f32 %v3048_v44, %v5094_v7  ;;  %v2540_v29 = vpop.f32.mrb[45].mxu0 }
 0x606   : > { %v2541_v10 = vadd.f32 %v5094_v7, %v2540_v29  ;;  %v3049_v11 = vpop.f32.mrb[46].mxu0 }
 0x607   : > { %v2585_v37 = vadd.f32 %v3206_v43, %v2549_v53  ;;  %v2552_v35 = vadd.f32 %v3049_v11, %v5094_v7  ;;  %v2543_v6 = vpop.f32.mrb[47].mxu0 }
 0x608   : > { %v2583_v20 = vadd.f32 %v3207_v9, %v2541_v10  ;;  %v2544_v61 = vadd.f32 %v5094_v7, %v2543_v6 }
 0x609   : > { %2617 = vst [vmem:[%s5104_s30 + $0xf0] sm:$0xff] %v2585_v37  ;;  %v2586_v56 = vadd.f32 %v3208_v45, %v2552_v35 }
 0x60a   : > { %2615 = vst [vmem:[%s5104_s30 + $0xe0] sm:$0xff] %v2583_v20  ;;  %v2584_v41 = vadd.f32 %v3209_v46, %v2544_v61 }
 0x60b   : > { %2618 = vst [vmem:[%s5104_s30 + $0xf8] sm:$0xff] %v2586_v56 }
 0x60c   : > { %2616 = vst [vmem:[%s5104_s30 + $0xe8] sm:$0xff] %v2584_v41 }
 0x60d   : > { %3279 = shalt.err (!%p3276_p11)
}
 0x60e   : > { %s3280_s25 = scalar_lea.hbm %s5197_s29, 4096  ;;  %s3284_s30 = scalar_lea.hbm %s5261_s13, 8192 }
 0x60f   : > { %p3281_p13 = scmp.ne.s32.totalorder %s5197_s29, %s3280_s25  ;;  %p3285_p5 = scmp.lt.u32.totalorder %s5197_s29, %s5261_s13 }
 0x610   : > { %p3286_p9 = scmp.lt.u32.totalorder %s3284_s30, %s3280_s25  ;;  %p3288_p12 = scmp.lt.u32.totalorder %s3280_s25, %s5197_s29 }
 0x611   : > { %p3282_p0 = pnand %p3281_p13, %p5416_p1 }
 0x612   : > { %p3287_p10 = por %p3286_p9, %p3285_p5 }
 0x613   : > { %p3283_p6 = pneg %p3282_p0 }
 0x614   : > { %p3289_p2 = por %p3288_p12, %p3287_p10 }
 0x616   : > { %p3290_p3 = pnand %p3289_p2, %p3283_p6 }
 0x618   : > { %3293 = shalt.err (!%p3290_p3)
}
 0x619   : > { %s3343_s16 = smov 128   ;;  %s3344_s23 = smov 8  }
 0x61a   : > { %3074 = dma.vmem_to_hbm [thread:$0]  (%p5416_p1), %s5199_s17, 4096, %s5197_s29, %s5207_s21, %s3343_s16, %s3343_s16, %s3344_s23  }
 0x61b PF: > { %s5417_s19 = sld [smem:[#allocation11_spill]]  ;;  %s5418_s27 = sld [smem:[#allocation15_spill]] }
 0x61c   : > { %p3091_p4 = scmp.ge.s32.totalorder %s3336_s28, 2 }
 0x621   : > { %s2648_s22 = sand.u32 1, %s5417_s19   ;;  %p5419_p7 = scmp.ne.s32.totalorder %s5418_s27, 0 }
 0x622   : > { %s2649_s25 = scalar_lea.sflag [#allocation4], %s2648_s22 }
 0x623   : > { %p3084_p8 = pnand %p3091_p4, %p5419_p7 }
 0x625   : > { %3319 = dma.done.wait (!%p3084_p8), %s2649_s25, 4096  }
 0x626   : > { %3321 = vsyncadd (!%p3084_p8), %s2649_s25, 4294963200  ;;  %s5420_s28 = sld [smem:[#allocation13_spill]]  ;;  %s5421_s15 = sld [smem:[#allocation12_spill]] }
 0x627   : > { %s5422_s27 = sld [smem:[#allocation14_spill]]  ;;  %s5423_s25 = smov %s3328_s26 }
 0x62c   : > { %p25_p11 = scmp.ge.s32.totalorder %s5420_s28, 4   ;;  %s5424_s26 = smov %s5421_s15 }
 0x62e   :  { %27 = sbr.rel (!%p25_p11) target bundleno = 5 (0x5), region = 124 }
 0x635   :  { %2654 = vsyncpa [#allocation3], 1 }
 0x636   :  { %2656 = vsyncpa [#allocation3 + $0x1], 1 }
 0x637   :  { %2657 = vsyncpa [#allocation6], 1 }
 0x638   :  { %2658 = vsyncpa [#allocation4], 1 }
 0x639   :  { %2660 = vsyncpa [#allocation4 + $0x1], 1 }

</bundles_post_ra>
